<compile_context>
chip_gen: v7x
topology: tpu7x:2x2x1
jax: 0.10.0
libtpu: 0.0.40
codegen_flags: <defaults>
</compile_context>

<pallas_src>
import functools

import jax
import jax.numpy as jnp
from jax.experimental import pallas as pl
from jax.experimental.pallas import tpu as pltpu


# ------------------------- generation-aware VMEM budget -------------------------

def _vmem_capacity_bytes():
    try:
        return int(pltpu.get_tpu_info().vmem_capacity_bytes)
    except Exception:
        return 64 * 1024 * 1024        # conservative (v7x-sized) fallback


def _compiler_params(dim_sem):
    limit = max(int(0.75 * _vmem_capacity_bytes()), 32 * 1024 * 1024)
    return pltpu.CompilerParams(dimension_semantics=dim_sem,
                                vmem_limit_bytes=limit)


def _check_vmem_fit(C, L):
    """Static working-set estimate for one grid step of the block kernel."""
    patch = 9 * C * L * 2                      # bf16 im2col patch
    shifts = 9 * C * L * 2                     # shifted taps before the concat
    acts = 5 * C * L * 4                       # y carry, y0, t, z, conv acc (f32)
    wts = 2 * 2 * (C * 9 * C * 2 + C * 4)      # one block's weights+bias, double-buffered
    need = patch + shifts + acts + wts
    budget = int(0.6 * _vmem_capacity_bytes())
    if need > budget:
        # TODO(synk): H-strip tiling with a 2-row halo so large feature maps fit VMEM.
        raise NotImplementedError(
            f"feature map too large for single-image VMEM residency: "
            f"need ~{need} B > budget {budget} B (H-strip tiling not implemented)")


# ------------------------------ in-kernel helpers --------------------------------

def _shift_flat(x, s):
    """y[:, i] = x[:, i + s] wherever i + s is in range (wrapped values land only on
    padded-border output positions, which are masked to zero afterwards)."""
    L = x.shape[-1]
    sh = s % L
    if sh == 0:
        return x
    return jnp.concatenate([x[:, sh:], x[:, :sh]], axis=-1)


def _patch9(x, Wp):
    """(C, L) padded-flat map -> (9*C, L): all 3x3 taps stacked (dy major, dx, C minor)."""
    taps = []
    for dy in range(3):
        for dx in range(3):
            taps.append(_shift_flat(x, (dy - 1) * Wp + (dx - 1)))
    return jnp.concatenate(taps, axis=0)


def _conv3x3(x_f32, w_bf16, Wp):
    """One 3x3 conv = single bf16 MXU matmul (Cout, 9*Cin) @ (9*Cin, L), f32 accumulate."""
    patch = _patch9(x_f32.astype(jnp.bfloat16), Wp)
    return jnp.dot(w_bf16, patch, preferred_element_type=jnp.float32)


# ----------------------------------- kernels -------------------------------------

def _first_conv_kernel(mask_ref, x_ref, w_ref, b_ref, o_ref, *, Wp):
    """conv3x3 + bias + LeakyReLU(0.1).  x_ref: (1, Cin, L) padded-flat, o_ref: (1, C, L)."""
    mask = mask_ref[...]                              # (1, L): 1 inside, 0 on border ring
    acc = _conv3x3(x_ref[0], w_ref[...], Wp)          # (C, L) f32
    acc = acc + b_ref[...]
    acc = jnp.maximum(acc, 0.1 * acc)                 # LeakyReLU(0.1): one vmul + vmax
    o_ref[...] = ((acc * mask)[None]).astype(o_ref.dtype)   # borders zeroed -> "pre-padded"


def _res_blocks_kernel(mask_ref, y0_ref, w1_ref, b1_ref, w2_ref, b2_ref, o_ref, *, Wp):
    """One ResidualBlockNoBN per grid step; the carried activation is the resident
    f32 output block (same block index across the block axis)."""
    @pl.when(pl.program_id(1) == 0)
    def _():
        o_ref[...] = y0_ref[...]                      # start the carry from the first conv

    mask = mask_ref[...]                              # (1, L)
    y = o_ref[0]                                      # (C, L) f32, zero borders
    t = _conv3x3(y, w1_ref[0], Wp) + b1_ref[0]        # conv1 + bias
    t = jnp.maximum(t, 0.0) * mask                    # ReLU, re-zero padding ring
    z = _conv3x3(t, w2_ref[0], Wp) + b2_ref[0]        # conv2 + bias
    o_ref[...] = (((y + z) * mask)[None]).astype(o_ref.dtype)   # residual add, re-pad


# ------------------------------ pallas_call wrappers -----------------------------

def _first_conv_call(mask, xp, w0, b0, Wp):
    N, Cin, L = xp.shape
    C = w0.shape[0]
    kernel = functools.partial(_first_conv_kernel, Wp=Wp)
    return pl.pallas_call(
        kernel,
        out_shape=jax.ShapeDtypeStruct((N, C, L), jnp.float32),
        grid=(N,),
        in_specs=[
            pl.BlockSpec((1, L), lambda n: (0, 0)),
            pl.BlockSpec((1, Cin, L), lambda n: (n, 0, 0)),
            pl.BlockSpec(w0.shape, lambda n: (0, 0)),
            pl.BlockSpec(b0.shape, lambda n: (0, 0)),
        ],
        out_specs=pl.BlockSpec((1, C, L), lambda n: (n, 0, 0)),
        compiler_params=_compiler_params(("parallel",)),
    )(mask, xp, w0, b0)


def _res_blocks_call(mask, y0, w1s, b1s, w2s, b2s, Wp):
    N, C, L = y0.shape
    num_block = w1s.shape[0]
    kernel = functools.partial(_res_blocks_kernel, Wp=Wp)
    return pl.pallas_call(
        kernel,
        out_shape=jax.ShapeDtypeStruct((N, C, L), jnp.float32),
        grid=(N, num_block),                           # block axis streams the weights
        in_specs=[
            pl.BlockSpec((1, L), lambda n, b: (0, 0)),
            pl.BlockSpec((1, C, L), lambda n, b: (n, 0, 0)),
            pl.BlockSpec((1, C, 9 * C), lambda n, b: (b, 0, 0)),
            pl.BlockSpec((1, C, 1), lambda n, b: (b, 0, 0)),
            pl.BlockSpec((1, C, 9 * C), lambda n, b: (b, 0, 0)),
            pl.BlockSpec((1, C, 1), lambda n, b: (b, 0, 0)),
        ],
        out_specs=pl.BlockSpec((1, C, L), lambda n, b: (n, 0, 0)),  # resident carry
        compiler_params=_compiler_params(("parallel", "arbitrary")),
    )(mask, y0, w1s, b1s, w2s, b2s)


# ---------------------------------- parameters ------------------------------------

def _to_tap_major(w_oihw):
    """PyTorch conv weight (Cout, Cin, 3, 3) -> (Cout, 9*Cin) tap-major bf16."""
    Cout, Cin, _, _ = w_oihw.shape
    return jnp.transpose(w_oihw, (0, 2, 3, 1)).reshape(Cout, 9 * Cin).astype(jnp.bfloat16)


def prepare_params(params):
    """One-time conversion of PyTorch-style params to kernel layout (hoisted)."""
    prep = {
        "w0": _to_tap_major(params["w0"]),
        "b0": params["b0"].reshape(-1, 1).astype(jnp.float32),
    }
    if params["blocks"]:
        w1s, b1s, w2s, b2s = [], [], [], []
        for (w1, b1, w2, b2) in params["blocks"]:
            w1s.append(_to_tap_major(w1)); b1s.append(b1.reshape(-1, 1))
            w2s.append(_to_tap_major(w2)); b2s.append(b2.reshape(-1, 1))
        prep["w1s"] = jnp.stack(w1s)
        prep["b1s"] = jnp.stack(b1s).astype(jnp.float32)
        prep["w2s"] = jnp.stack(w2s)
        prep["b2s"] = jnp.stack(b2s).astype(jnp.float32)
    return prep


def init_params(key, num_in_ch, num_out_ch, num_block):
    """Deterministic synthetic parameters (shapes match the PyTorch module)."""
    keys = jax.random.split(key, 2 + 4 * num_block)
    params = {
        "w0": 0.1 * jax.random.normal(keys[0], (num_out_ch, num_in_ch, 3, 3), jnp.float32),
        "b0": 0.05 * jax.random.normal(keys[1], (num_out_ch,), jnp.float32),
        "blocks": [],
    }
    for i in range(num_block):
        k = keys[2 + 4 * i: 6 + 4 * i]
        w1 = 0.05 * jax.random.normal(k[0], (num_out_ch, num_out_ch, 3, 3), jnp.float32)
        b1 = 0.02 * jax.random.normal(k[1], (num_out_ch,), jnp.float32)
        w2 = 0.05 * jax.random.normal(k[2], (num_out_ch, num_out_ch, 3, 3), jnp.float32)
        b2 = 0.02 * jax.random.normal(k[3], (num_out_ch,), jnp.float32)
        params["blocks"].append((w1, b1, w2, b2))
    return params


# ------------------------------------ forward -------------------------------------

def conv_residual_blocks_forward(x_nchw, prep):
    """Pallas forward matching ConvResidualBlocks.forward (input/output NCHW)."""
    N, Cin, H, W = x_nchw.shape
    Hp, Wp = H + 2, W + 2
    L = Hp * Wp
    C = prep["b0"].shape[0]
    _check_vmem_fit(C, L)

    # Channel-major padded-flat layout: (N, C, L) with a zero 1-pixel border.
    # (No channel transpose needed: NCHW is already channel-major.)
    xp = jnp.pad(x_nchw, ((0, 0), (0, 0), (1, 1), (1, 1))).reshape(N, Cin, L)

    # Interior mask: 1 inside the H x W image, 0 on the padding ring.
    idx = jnp.arange(L, dtype=jnp.int32)
    row, col = idx // Wp, idx % Wp
    mask = (((row >= 1) & (row <= H) & (col >= 1) & (col <= W))
            .astype(jnp.float32).reshape(1, L))

    y = _first_conv_call(mask, xp, prep["w0"], prep["b0"], Wp)
    if "w1s" in prep:
        y = _res_blocks_call(mask, y, prep["w1s"], prep["b1s"],
                             prep["w2s"], prep["b2s"], Wp)

    # Un-pad back to NCHW.
    return y.reshape(N, C, Hp, Wp)[:, :, 1:-1, 1:-1]


# ------- plain-JAX reference (NCHW, same semantics as the PyTorch module) ---------

def _ref_conv(x, w, b):
    y = jax.lax.conv_general_dilated(
        x, w, window_strides=(1, 1), padding=((1, 1), (1, 1)),
        dimension_numbers=("NCHW", "OIHW", "NCHW"))
    return y + b[None, :, None, None]


def reference_forward(x_nchw, params):
    y = _ref_conv(x_nchw, params["w0"], params["b0"])
    y = jnp.where(y >= 0.0, y, 0.1 * y)
    for (w1, b1, w2, b2) in params["blocks"]:
        t = jnp.maximum(_ref_conv(y, w1, b1), 0.0)
        y = y + _ref_conv(t, w2, b2)
    return y


if __name__ == "__main__":
    # Small shapes consistent with the module: ConvResidualBlocks(4, 32, 2)
    N, Cin, H, W = 2, 4, 16, 16
    Cout, num_block = 32, 2

    key = jax.random.PRNGKey(0)
    k_x, k_p = jax.random.split(key)
    x = jax.random.normal(k_x, (N, Cin, H, W), jnp.float32)
    params = init_params(k_p, Cin, Cout, num_block)
    prep = prepare_params(params)            # weight layout conversion hoisted out of forward

    fwd = jax.jit(conv_residual_blocks_forward)
    out = jax.block_until_ready(fwd(x, prep))

    ref = reference_forward(x, params)
    err = float(jnp.max(jnp.abs(out - ref)))
    scale = float(jnp.max(jnp.abs(ref))) + 1e-6

    assert out.shape == (N, Cout, H, W), out.shape
    # bf16 MXU operands with f32 accumulation: ~1e-2 relative tolerance expected.
    assert err <= 5e-2 * scale + 1e-3, f"mismatch vs reference: {err} (ref scale {scale})"
    print("KERNEL_OK")
</pallas_src>

<mosaic_0001>
module attributes {stable_mosaic.version = 11 : i64} {
  func.func @_first_conv_kernel(%arg0: i32, %arg1: memref<1x324xf32, #tpu.memory_space<vmem>>, %arg2: memref<1x4x324xf32, #tpu.memory_space<vmem>>, %arg3: memref<32x36xbf16, #tpu.memory_space<vmem>>, %arg4: memref<32x1xf32, #tpu.memory_space<vmem>>, %arg5: memref<1x32x324xf32, #tpu.memory_space<vmem>>) attributes {dimension_semantics = [#tpu.dimension_semantics<parallel>], iteration_bounds = array<i64: 2>, scalar_prefetch = 0 : i64, scratch_operands = 0 : i64, tpu.core_type = #tpu.core_type<tc>, window_params = [{pipeline_mode = #tpu.pipeline_mode<synchronous>, transform_indices = @transform_0, window_bounds = array<i64: 1, 324>}, {transform_indices = @transform_1, window_bounds = array<i64: 1, 4, 324>}, {pipeline_mode = #tpu.pipeline_mode<synchronous>, transform_indices = @transform_2, window_bounds = array<i64: 32, 36>}, {pipeline_mode = #tpu.pipeline_mode<synchronous>, transform_indices = @transform_3, window_bounds = array<i64: 32, 1>}, {transform_indices = @transform_4, window_bounds = array<i64: 1, 32, 324>}]} {
    %c0 = arith.constant 0 : index
    %c0_0 = arith.constant 0 : index
    %0 = vector.load %arg1[%c0, %c0_0] : memref<1x324xf32, #tpu.memory_space<vmem>>, vector<1x324xf32>
    %c0_1 = arith.constant 0 : index
    %c0_2 = arith.constant 0 : index
    %c0_3 = arith.constant 0 : index
    %1 = vector.load %arg2[%c0_1, %c0_2, %c0_3] : memref<1x4x324xf32, #tpu.memory_space<vmem>>, vector<1x4x324xf32>
    %2 = vector.shape_cast %1 : vector<1x4x324xf32> to vector<4x324xf32>
    %c0_4 = arith.constant 0 : index
    %c0_5 = arith.constant 0 : index
    %3 = vector.load %arg3[%c0_4, %c0_5] : memref<32x36xbf16, #tpu.memory_space<vmem>>, vector<32x36xbf16>
    %4 = arith.truncf %2 : vector<4x324xf32> to vector<4x324xbf16>
    %5 = vector.extract_strided_slice %4 {offsets = [0, 305], sizes = [4, 19], strides = [1, 1]} : vector<4x324xbf16> to vector<4x19xbf16>
    %6 = vector.extract_strided_slice %4 {offsets = [0, 0], sizes = [4, 305], strides = [1, 1]} : vector<4x324xbf16> to vector<4x305xbf16>
    %7 = tpu.concatenate %5, %6 in 1 : vector<4x19xbf16>, vector<4x305xbf16> -> vector<4x324xbf16>
    %8 = vector.extract_strided_slice %4 {offsets = [0, 306], sizes = [4, 18], strides = [1, 1]} : vector<4x324xbf16> to vector<4x18xbf16>
    %9 = vector.extract_strided_slice %4 {offsets = [0, 0], sizes = [4, 306], strides = [1, 1]} : vector<4x324xbf16> to vector<4x306xbf16>
    %10 = tpu.concatenate %8, %9 in 1 : vector<4x18xbf16>, vector<4x306xbf16> -> vector<4x324xbf16>
    %11 = vector.extract_strided_slice %4 {offsets = [0, 307], sizes = [4, 17], strides = [1, 1]} : vector<4x324xbf16> to vector<4x17xbf16>
    %12 = vector.extract_strided_slice %4 {offsets = [0, 0], sizes = [4, 307], strides = [1, 1]} : vector<4x324xbf16> to vector<4x307xbf16>
    %13 = tpu.concatenate %11, %12 in 1 : vector<4x17xbf16>, vector<4x307xbf16> -> vector<4x324xbf16>
    %14 = vector.extract_strided_slice %4 {offsets = [0, 323], sizes = [4, 1], strides = [1, 1]} : vector<4x324xbf16> to vector<4x1xbf16>
    %15 = vector.extract_strided_slice %4 {offsets = [0, 0], sizes = [4, 323], strides = [1, 1]} : vector<4x324xbf16> to vector<4x323xbf16>
    %16 = tpu.concatenate %14, %15 in 1 : vector<4x1xbf16>, vector<4x323xbf16> -> vector<4x324xbf16>
    %17 = vector.extract_strided_slice %4 {offsets = [0, 1], sizes = [4, 323], strides = [1, 1]} : vector<4x324xbf16> to vector<4x323xbf16>
    %18 = vector.extract_strided_slice %4 {offsets = [0, 0], sizes = [4, 1], strides = [1, 1]} : vector<4x324xbf16> to vector<4x1xbf16>
    %19 = tpu.concatenate %17, %18 in 1 : vector<4x323xbf16>, vector<4x1xbf16> -> vector<4x324xbf16>
    %20 = vector.extract_strided_slice %4 {offsets = [0, 17], sizes = [4, 307], strides = [1, 1]} : vector<4x324xbf16> to vector<4x307xbf16>
    %21 = vector.extract_strided_slice %4 {offsets = [0, 0], sizes = [4, 17], strides = [1, 1]} : vector<4x324xbf16> to vector<4x17xbf16>
    %22 = tpu.concatenate %20, %21 in 1 : vector<4x307xbf16>, vector<4x17xbf16> -> vector<4x324xbf16>
    %23 = vector.extract_strided_slice %4 {offsets = [0, 18], sizes = [4, 306], strides = [1, 1]} : vector<4x324xbf16> to vector<4x306xbf16>
    %24 = vector.extract_strided_slice %4 {offsets = [0, 0], sizes = [4, 18], strides = [1, 1]} : vector<4x324xbf16> to vector<4x18xbf16>
    %25 = tpu.concatenate %23, %24 in 1 : vector<4x306xbf16>, vector<4x18xbf16> -> vector<4x324xbf16>
    %26 = vector.extract_strided_slice %4 {offsets = [0, 19], sizes = [4, 305], strides = [1, 1]} : vector<4x324xbf16> to vector<4x305xbf16>
    %27 = vector.extract_strided_slice %4 {offsets = [0, 0], sizes = [4, 19], strides = [1, 1]} : vector<4x324xbf16> to vector<4x19xbf16>
    %28 = tpu.concatenate %26, %27 in 1 : vector<4x305xbf16>, vector<4x19xbf16> -> vector<4x324xbf16>
    %29 = tpu.concatenate %7, %10, %13, %16, %4, %19, %22, %25, %28 in 0 : vector<4x324xbf16>, vector<4x324xbf16>, vector<4x324xbf16>, vector<4x324xbf16>, vector<4x324xbf16>, vector<4x324xbf16>, vector<4x324xbf16>, vector<4x324xbf16>, vector<4x324xbf16> -> vector<36x324xbf16>
    %cst = arith.constant dense<0.000000e+00> : vector<32x324xf32>
    %30 = tpu.matmul %3, %29, %cst {dimension_numbers = #tpu.dot_dimension_numbers<[1], [0], [0], [1], [0, 0, 1, 1], [], []>} : vector<32x36xbf16>, vector<36x324xbf16>, vector<32x324xf32> -> vector<32x324xf32>
    %c0_6 = arith.constant 0 : index
    %c0_7 = arith.constant 0 : index
    %31 = vector.load %arg4[%c0_6, %c0_7] : memref<32x1xf32, #tpu.memory_space<vmem>>, vector<32x1xf32>
    %32 = vector.broadcast %31 : vector<32x1xf32> to vector<32x324xf32>
    %33 = arith.addf %30, %32 : vector<32x324xf32>
    %cst_8 = arith.constant 1.000000e-01 : f32
    %34 = vector.broadcast %cst_8 : f32 to vector<32x324xf32>
    %35 = arith.mulf %34, %33 : vector<32x324xf32>
    %36 = arith.maximumf %33, %35 : vector<32x324xf32>
    %37 = vector.broadcast %0 : vector<1x324xf32> to vector<32x324xf32>
    %38 = arith.mulf %36, %37 : vector<32x324xf32>
    %39 = vector.shape_cast %38 : vector<32x324xf32> to vector<1x32x324xf32>
    %c0_9 = arith.constant 0 : index
    %c0_10 = arith.constant 0 : index
    %c0_11 = arith.constant 0 : index
    %40 = vector.load %arg5[%c0_9, %c0_10, %c0_11] : memref<1x32x324xf32, #tpu.memory_space<vmem>>, vector<1x32x324xf32>
    tpu.vector_store %arg5[%c0_9, %c0_10, %c0_11], %39 {strides = array<i32>} : memref<1x32x324xf32, #tpu.memory_space<vmem>>, vector<1x32x324xf32>,
    return
  }
  func.func @transform_0(%arg0: i32) -> (i32, i32) {
    %c0_i32 = arith.constant 0 : i32
    %c0_i32_0 = arith.constant 0 : i32
    %c0_i32_1 = arith.constant 0 : i32
    return %c0_i32, %c0_i32_0 : i32, i32
  }
  func.func @transform_1(%arg0: i32) -> (i32, i32, i32) {
    %c0_i32 = arith.constant 0 : i32
    %c0_i32_0 = arith.constant 0 : i32
    %c0_i32_1 = arith.constant 0 : i32
    return %arg0, %c0_i32, %c0_i32_0 : i32, i32, i32
  }
  func.func @transform_2(%arg0: i32) -> (i32, i32) {
    %c0_i32 = arith.constant 0 : i32
    %c0_i32_0 = arith.constant 0 : i32
    %c0_i32_1 = arith.constant 0 : i32
    return %c0_i32, %c0_i32_0 : i32, i32
  }
  func.func @transform_3(%arg0: i32) -> (i32, i32) {
    %c0_i32 = arith.constant 0 : i32
    %c0_i32_0 = arith.constant 0 : i32
    %c0_i32_1 = arith.constant 0 : i32
    return %c0_i32, %c0_i32_0 : i32, i32
  }
  func.func @transform_4(%arg0: i32) -> (i32, i32, i32) {
    %c0_i32 = arith.constant 0 : i32
    %c0_i32_0 = arith.constant 0 : i32
    %c0_i32_1 = arith.constant 0 : i32
    return %arg0, %c0_i32, %c0_i32_0 : i32, i32, i32
  }
}

module attributes {stable_mosaic.version = 11 : i64} {
  func.func @_res_blocks_kernel(%arg0: i32, %arg1: i32, %arg2: memref<1x324xf32, #tpu.memory_space<vmem>>, %arg3: memref<1x32x324xf32, #tpu.memory_space<vmem>>, %arg4: memref<1x32x288xbf16, #tpu.memory_space<vmem>>, %arg5: memref<1x32x1xf32, #tpu.memory_space<vmem>>, %arg6: memref<1x32x288xbf16, #tpu.memory_space<vmem>>, %arg7: memref<1x32x1xf32, #tpu.memory_space<vmem>>, %arg8: memref<1x32x324xf32, #tpu.memory_space<vmem>>) attributes {dimension_semantics = [#tpu.dimension_semantics<parallel>, #tpu.dimension_semantics<arbitrary>], iteration_bounds = array<i64: 2, 2>, scalar_prefetch = 0 : i64, scratch_operands = 0 : i64, tpu.core_type = #tpu.core_type<tc>, window_params = [{pipeline_mode = #tpu.pipeline_mode<synchronous>, transform_indices = @transform_0, window_bounds = array<i64: 1, 324>}, {transform_indices = @transform_1, window_bounds = array<i64: 1, 32, 324>}, {transform_indices = @transform_2, window_bounds = array<i64: 1, 32, 288>}, {transform_indices = @transform_3, window_bounds = array<i64: 1, 32, 1>}, {transform_indices = @transform_4, window_bounds = array<i64: 1, 32, 288>}, {transform_indices = @transform_5, window_bounds = array<i64: 1, 32, 1>}, {transform_indices = @transform_6, window_bounds = array<i64: 1, 32, 324>}]} {
    %c0_i32 = arith.constant 0 : i32
    %0 = arith.cmpi eq, %arg1, %c0_i32 : i32
    %1 = arith.extui %0 : i1 to i32
    %c0_i32_0 = arith.constant 0 : i32
    %2 = arith.cmpi ne, %1, %c0_i32_0 : i32
    scf.if %2 {
      %c0_22 = arith.constant 0 : index
      %c0_23 = arith.constant 0 : index
      %c0_24 = arith.constant 0 : index
      %81 = vector.load %arg3[%c0_22, %c0_23, %c0_24] : memref<1x32x324xf32, #tpu.memory_space<vmem>>, vector<1x32x324xf32>
      %c0_25 = arith.constant 0 : index
      %c0_26 = arith.constant 0 : index
      %c0_27 = arith.constant 0 : index
      %82 = vector.load %arg8[%c0_25, %c0_26, %c0_27] : memref<1x32x324xf32, #tpu.memory_space<vmem>>, vector<1x32x324xf32>
      tpu.vector_store %arg8[%c0_25, %c0_26, %c0_27], %81 {strides = array<i32>} : memref<1x32x324xf32, #tpu.memory_space<vmem>>, vector<1x32x324xf32>,
    } else {
    }
    %c0 = arith.constant 0 : index
    %c0_1 = arith.constant 0 : index
    %3 = vector.load %arg2[%c0, %c0_1] : memref<1x324xf32, #tpu.memory_space<vmem>>, vector<1x324xf32>
    %c0_2 = arith.constant 0 : index
    %c0_3 = arith.constant 0 : index
    %c0_4 = arith.constant 0 : index
    %4 = vector.load %arg8[%c0_2, %c0_3, %c0_4] : memref<1x32x324xf32, #tpu.memory_space<vmem>>, vector<1x32x324xf32>
    %5 = vector.shape_cast %4 : vector<1x32x324xf32> to vector<32x324xf32>
    %c0_5 = arith.constant 0 : index
    %c0_6 = arith.constant 0 : index
    %c0_7 = arith.constant 0 : index
    %6 = vector.load %arg4[%c0_5, %c0_6, %c0_7] : memref<1x32x288xbf16, #tpu.memory_space<vmem>>, vector<1x32x288xbf16>
    %7 = vector.shape_cast %6 : vector<1x32x288xbf16> to vector<32x288xbf16>
    %8 = arith.truncf %5 : vector<32x324xf32> to vector<32x324xbf16>
    %9 = vector.extract_strided_slice %8 {offsets = [0, 305], sizes = [32, 19], strides = [1, 1]} : vector<32x324xbf16> to vector<32x19xbf16>
    %10 = vector.extract_strided_slice %8 {offsets = [0, 0], sizes = [32, 305], strides = [1, 1]} : vector<32x324xbf16> to vector<32x305xbf16>
    %11 = tpu.concatenate %9, %10 in 1 : vector<32x19xbf16>, vector<32x305xbf16> -> vector<32x324xbf16>
    %12 = vector.extract_strided_slice %8 {offsets = [0, 306], sizes = [32, 18], strides = [1, 1]} : vector<32x324xbf16> to vector<32x18xbf16>
    %13 = vector.extract_strided_slice %8 {offsets = [0, 0], sizes = [32, 306], strides = [1, 1]} : vector<32x324xbf16> to vector<32x306xbf16>
    %14 = tpu.concatenate %12, %13 in 1 : vector<32x18xbf16>, vector<32x306xbf16> -> vector<32x324xbf16>
    %15 = vector.extract_strided_slice %8 {offsets = [0, 307], sizes = [32, 17], strides = [1, 1]} : vector<32x324xbf16> to vector<32x17xbf16>
    %16 = vector.extract_strided_slice %8 {offsets = [0, 0], sizes = [32, 307], strides = [1, 1]} : vector<32x324xbf16> to vector<32x307xbf16>
    %17 = tpu.concatenate %15, %16 in 1 : vector<32x17xbf16>, vector<32x307xbf16> -> vector<32x324xbf16>
    %18 = vector.extract_strided_slice %8 {offsets = [0, 323], sizes = [32, 1], strides = [1, 1]} : vector<32x324xbf16> to vector<32x1xbf16>
    %19 = vector.extract_strided_slice %8 {offsets = [0, 0], sizes = [32, 323], strides = [1, 1]} : vector<32x324xbf16> to vector<32x323xbf16>
    %20 = tpu.concatenate %18, %19 in 1 : vector<32x1xbf16>, vector<32x323xbf16> -> vector<32x324xbf16>
    %21 = vector.extract_strided_slice %8 {offsets = [0, 1], sizes = [32, 323], strides = [1, 1]} : vector<32x324xbf16> to vector<32x323xbf16>
    %22 = vector.extract_strided_slice %8 {offsets = [0, 0], sizes = [32, 1], strides = [1, 1]} : vector<32x324xbf16> to vector<32x1xbf16>
    %23 = tpu.concatenate %21, %22 in 1 : vector<32x323xbf16>, vector<32x1xbf16> -> vector<32x324xbf16>
    %24 = vector.extract_strided_slice %8 {offsets = [0, 17], sizes = [32, 307], strides = [1, 1]} : vector<32x324xbf16> to vector<32x307xbf16>
    %25 = vector.extract_strided_slice %8 {offsets = [0, 0], sizes = [32, 17], strides = [1, 1]} : vector<32x324xbf16> to vector<32x17xbf16>
    %26 = tpu.concatenate %24, %25 in 1 : vector<32x307xbf16>, vector<32x17xbf16> -> vector<32x324xbf16>
    %27 = vector.extract_strided_slice %8 {offsets = [0, 18], sizes = [32, 306], strides = [1, 1]} : vector<32x324xbf16> to vector<32x306xbf16>
    %28 = vector.extract_strided_slice %8 {offsets = [0, 0], sizes = [32, 18], strides = [1, 1]} : vector<32x324xbf16> to vector<32x18xbf16>
    %29 = tpu.concatenate %27, %28 in 1 : vector<32x306xbf16>, vector<32x18xbf16> -> vector<32x324xbf16>
    %30 = vector.extract_strided_slice %8 {offsets = [0, 19], sizes = [32, 305], strides = [1, 1]} : vector<32x324xbf16> to vector<32x305xbf16>
    %31 = vector.extract_strided_slice %8 {offsets = [0, 0], sizes = [32, 19], strides = [1, 1]} : vector<32x324xbf16> to vector<32x19xbf16>
    %32 = tpu.concatenate %30, %31 in 1 : vector<32x305xbf16>, vector<32x19xbf16> -> vector<32x324xbf16>
    %33 = tpu.concatenate %11, %14, %17, %20, %8, %23, %26, %29, %32 in 0 : vector<32x324xbf16>, vector<32x324xbf16>, vector<32x324xbf16>, vector<32x324xbf16>, vector<32x324xbf16>, vector<32x324xbf16>, vector<32x324xbf16>, vector<32x324xbf16>, vector<32x324xbf16> -> vector<288x324xbf16>
    %cst = arith.constant dense<0.000000e+00> : vector<32x324xf32>
    %34 = tpu.matmul %7, %33, %cst {dimension_numbers = #tpu.dot_dimension_numbers<[1], [0], [0], [1], [0, 0, 1, 1], [], []>} : vector<32x288xbf16>, vector<288x324xbf16>, vector<32x324xf32> -> vector<32x324xf32>
    %c0_8 = arith.constant 0 : index
    %c0_9 = arith.constant 0 : index
    %c0_10 = arith.constant 0 : index
    %35 = vector.load %arg5[%c0_8, %c0_9, %c0_10] : memref<1x32x1xf32, #tpu.memory_space<vmem>>, vector<1x32x1xf32>
    %36 = vector.shape_cast %35 : vector<1x32x1xf32> to vector<32x1xf32>
    %37 = vector.broadcast %36 : vector<32x1xf32> to vector<32x324xf32>
    %38 = arith.addf %34, %37 : vector<32x324xf32>
    %cst_11 = arith.constant 0.000000e+00 : f32
    %39 = vector.broadcast %cst_11 : f32 to vector<32x324xf32>
    %40 = arith.maximumf %38, %39 : vector<32x324xf32>
    %41 = vector.broadcast %3 : vector<1x324xf32> to vector<32x324xf32>
    %42 = arith.mulf %40, %41 : vector<32x324xf32>
    %c0_12 = arith.constant 0 : index
    %c0_13 = arith.constant 0 : index
    %c0_14 = arith.constant 0 : index
    %43 = vector.load %arg6[%c0_12, %c0_13, %c0_14] : memref<1x32x288xbf16, #tpu.memory_space<vmem>>, vector<1x32x288xbf16>
    %44 = vector.shape_cast %43 : vector<1x32x288xbf16> to vector<32x288xbf16>
    %45 = arith.truncf %42 : vector<32x324xf32> to vector<32x324xbf16>
    %46 = vector.extract_strided_slice %45 {offsets = [0, 305], sizes = [32, 19], strides = [1, 1]} : vector<32x324xbf16> to vector<32x19xbf16>
    %47 = vector.extract_strided_slice %45 {offsets = [0, 0], sizes = [32, 305], strides = [1, 1]} : vector<32x324xbf16> to vector<32x305xbf16>
    %48 = tpu.concatenate %46, %47 in 1 : vector<32x19xbf16>, vector<32x305xbf16> -> vector<32x324xbf16>
    %49 = vector.extract_strided_slice %45 {offsets = [0, 306], sizes = [32, 18], strides = [1, 1]} : vector<32x324xbf16> to vector<32x18xbf16>
    %50 = vector.extract_strided_slice %45 {offsets = [0, 0], sizes = [32, 306], strides = [1, 1]} : vector<32x324xbf16> to vector<32x306xbf16>
    %51 = tpu.concatenate %49, %50 in 1 : vector<32x18xbf16>, vector<32x306xbf16> -> vector<32x324xbf16>
    %52 = vector.extract_strided_slice %45 {offsets = [0, 307], sizes = [32, 17], strides = [1, 1]} : vector<32x324xbf16> to vector<32x17xbf16>
    %53 = vector.extract_strided_slice %45 {offsets = [0, 0], sizes = [32, 307], strides = [1, 1]} : vector<32x324xbf16> to vector<32x307xbf16>
    %54 = tpu.concatenate %52, %53 in 1 : vector<32x17xbf16>, vector<32x307xbf16> -> vector<32x324xbf16>
    %55 = vector.extract_strided_slice %45 {offsets = [0, 323], sizes = [32, 1], strides = [1, 1]} : vector<32x324xbf16> to vector<32x1xbf16>
    %56 = vector.extract_strided_slice %45 {offsets = [0, 0], sizes = [32, 323], strides = [1, 1]} : vector<32x324xbf16> to vector<32x323xbf16>
    %57 = tpu.concatenate %55, %56 in 1 : vector<32x1xbf16>, vector<32x323xbf16> -> vector<32x324xbf16>
    %58 = vector.extract_strided_slice %45 {offsets = [0, 1], sizes = [32, 323], strides = [1, 1]} : vector<32x324xbf16> to vector<32x323xbf16>
    %59 = vector.extract_strided_slice %45 {offsets = [0, 0], sizes = [32, 1], strides = [1, 1]} : vector<32x324xbf16> to vector<32x1xbf16>
    %60 = tpu.concatenate %58, %59 in 1 : vector<32x323xbf16>, vector<32x1xbf16> -> vector<32x324xbf16>
    %61 = vector.extract_strided_slice %45 {offsets = [0, 17], sizes = [32, 307], strides = [1, 1]} : vector<32x324xbf16> to vector<32x307xbf16>
    %62 = vector.extract_strided_slice %45 {offsets = [0, 0], sizes = [32, 17], strides = [1, 1]} : vector<32x324xbf16> to vector<32x17xbf16>
    %63 = tpu.concatenate %61, %62 in 1 : vector<32x307xbf16>, vector<32x17xbf16> -> vector<32x324xbf16>
    %64 = vector.extract_strided_slice %45 {offsets = [0, 18], sizes = [32, 306], strides = [1, 1]} : vector<32x324xbf16> to vector<32x306xbf16>
    %65 = vector.extract_strided_slice %45 {offsets = [0, 0], sizes = [32, 18], strides = [1, 1]} : vector<32x324xbf16> to vector<32x18xbf16>
    %66 = tpu.concatenate %64, %65 in 1 : vector<32x306xbf16>, vector<32x18xbf16> -> vector<32x324xbf16>
    %67 = vector.extract_strided_slice %45 {offsets = [0, 19], sizes = [32, 305], strides = [1, 1]} : vector<32x324xbf16> to vector<32x305xbf16>
    %68 = vector.extract_strided_slice %45 {offsets = [0, 0], sizes = [32, 19], strides = [1, 1]} : vector<32x324xbf16> to vector<32x19xbf16>
    %69 = tpu.concatenate %67, %68 in 1 : vector<32x305xbf16>, vector<32x19xbf16> -> vector<32x324xbf16>
    %70 = tpu.concatenate %48, %51, %54, %57, %45, %60, %63, %66, %69 in 0 : vector<32x324xbf16>, vector<32x324xbf16>, vector<32x324xbf16>, vector<32x324xbf16>, vector<32x324xbf16>, vector<32x324xbf16>, vector<32x324xbf16>, vector<32x324xbf16>, vector<32x324xbf16> -> vector<288x324xbf16>
    %cst_15 = arith.constant dense<0.000000e+00> : vector<32x324xf32>
    %71 = tpu.matmul %44, %70, %cst_15 {dimension_numbers = #tpu.dot_dimension_numbers<[1], [0], [0], [1], [0, 0, 1, 1], [], []>} : vector<32x288xbf16>, vector<288x324xbf16>, vector<32x324xf32> -> vector<32x324xf32>
    %c0_16 = arith.constant 0 : index
    %c0_17 = arith.constant 0 : index
    %c0_18 = arith.constant 0 : index
    %72 = vector.load %arg7[%c0_16, %c0_17, %c0_18] : memref<1x32x1xf32, #tpu.memory_space<vmem>>, vector<1x32x1xf32>
    %73 = vector.shape_cast %72 : vector<1x32x1xf32> to vector<32x1xf32>
    %74 = vector.broadcast %73 : vector<32x1xf32> to vector<32x324xf32>
    %75 = arith.addf %71, %74 : vector<32x324xf32>
    %76 = arith.addf %5, %75 : vector<32x324xf32>
    %77 = vector.broadcast %3 : vector<1x324xf32> to vector<32x324xf32>
    %78 = arith.mulf %76, %77 : vector<32x324xf32>
    %79 = vector.shape_cast %78 : vector<32x324xf32> to vector<1x32x324xf32>
    %c0_19 = arith.constant 0 : index
    %c0_20 = arith.constant 0 : index
    %c0_21 = arith.constant 0 : index
    %80 = vector.load %arg8[%c0_19, %c0_20, %c0_21] : memref<1x32x324xf32, #tpu.memory_space<vmem>>, vector<1x32x324xf32>
    tpu.vector_store %arg8[%c0_19, %c0_20, %c0_21], %79 {strides = array<i32>} : memref<1x32x324xf32, #tpu.memory_space<vmem>>, vector<1x32x324xf32>,
    return
  }
  func.func @transform_0(%arg0: i32, %arg1: i32) -> (i32, i32) {
    %c0_i32 = arith.constant 0 : i32
    %c0_i32_0 = arith.constant 0 : i32
    %c0_i32_1 = arith.constant 0 : i32
    return %c0_i32, %c0_i32_0 : i32, i32
  }
  func.func @transform_1(%arg0: i32, %arg1: i32) -> (i32, i32, i32) {
    %c0_i32 = arith.constant 0 : i32
    %c0_i32_0 = arith.constant 0 : i32
    %c0_i32_1 = arith.constant 0 : i32
    return %arg0, %c0_i32, %c0_i32_0 : i32, i32, i32
  }
  func.func @transform_2(%arg0: i32, %arg1: i32) -> (i32, i32, i32) {
    %c0_i32 = arith.constant 0 : i32
    %c0_i32_0 = arith.constant 0 : i32
    %c0_i32_1 = arith.constant 0 : i32
    return %arg1, %c0_i32, %c0_i32_0 : i32, i32, i32
  }
  func.func @transform_3(%arg0: i32, %arg1: i32) -> (i32, i32, i32) {
    %c0_i32 = arith.constant 0 : i32
    %c0_i32_0 = arith.constant 0 : i32
    %c0_i32_1 = arith.constant 0 : i32
    return %arg1, %c0_i32, %c0_i32_0 : i32, i32, i32
  }
  func.func @transform_4(%arg0: i32, %arg1: i32) -> (i32, i32, i32) {
    %c0_i32 = arith.constant 0 : i32
    %c0_i32_0 = arith.constant 0 : i32
    %c0_i32_1 = arith.constant 0 : i32
    return %arg1, %c0_i32, %c0_i32_0 : i32, i32, i32
  }
  func.func @transform_5(%arg0: i32, %arg1: i32) -> (i32, i32, i32) {
    %c0_i32 = arith.constant 0 : i32
    %c0_i32_0 = arith.constant 0 : i32
    %c0_i32_1 = arith.constant 0 : i32
    return %arg1, %c0_i32, %c0_i32_0 : i32, i32, i32
  }
  func.func @transform_6(%arg0: i32, %arg1: i32) -> (i32, i32, i32) {
    %c0_i32 = arith.constant 0 : i32
    %c0_i32_0 = arith.constant 0 : i32
    %c0_i32_1 = arith.constant 0 : i32
    return %arg0, %c0_i32, %c0_i32_0 : i32, i32, i32
  }
}

</mosaic_0001>

<bundles_post_ra>
// kernel: conv_residual_blocks_forward.2
= control target key start
LH: loop header
LB: loop body
LE: loop exit
PB: predicated region body
PF: predicated region fallthrough
CT: control target
= control target key end

     0   :  { %s794_s15 = smov 0   ;;  %s963_s0 = inlined_call_operand.vmem [shape: f32[1,324], index: 0, kind: input, shape index: {}]   ;;  %s964_s1 = inlined_call_operand.vmem [shape: f32[2,4,324], index: 1, kind: input, shape index: {}]   ;;  %s965_s2 = inlined_call_operand.vmem [shape: bf16[32,36], index: 2, kind: input, shape index: {}]   ;;  %s966_s3 = inlined_call_operand.vmem [shape: f32[32,1], index: 3, kind: input, shape index: {}]   ;;  %s967_s4 = inlined_call_operand.vmem [shape: f32[2,32,324], index: 4, kind: output, shape index: {}]  }
   0x1 LB: > { %s680_s16 = sadd.s32 4294967295, %s750_s15   ;;  %p684_p0 = scmp.ge.s32.totalorder %s750_s15, 1  ;;  %s750_s15 = sphi %s794_s15, %s14_s15  }
   0x2   : > { %p162_p1 = scmp.lt.s32.totalorder %s750_s15, 3 }
   0x4   : > { %p163_p2 = pnand %p684_p0, %p162_p1 }
   0x5   : > { %p188_p3 = scmp.lt.s32.totalorder (!%p163_p2), %s680_s16, 1  ;;  %s752_s21 = smov (!%p163_p2), 78   ;;  %v763_v6 = vmov (!%p163_p2), 0   ;;  %v848_v7 = vld [vmem:[%s965_s2] sm:$0xff] (!%p163_p2)   ;;  %vm443_vm0 = vcmask (!%p163_p2), 293888   ;;  %v410_v9 = vld [vmem:[%s966_s3 + $0x8] sm:$0xff] (!%p163_p2) }
   0x6   : > { %166 = sbr.rel (%p163_p2) target bundleno = 431 (0x1af), region = 36  ;;  %s753_s22 = smov (!%p163_p2), 18   ;;  %490 = vmatprep.mubr.bf16.mxu0 (!%p163_p2), %v763_v6  ;;  %739 = vset.pattern.permute.xlu0 (!%p163_p2), %v763_v6  ;;  %v409_v8 = vld [vmem:[%s966_s3] sm:$0xff] (!%p163_p2)  ;;  %v411_v10 = vld [vmem:[%s966_s3 + $0x10] sm:$0xff] (!%p163_p2)  ;;  %v412_v11 = vld [vmem:[%s966_s3 + $0x18] sm:$0xff] (!%p163_p2)  ;;  %vm238_vm1 = vcmask (!%p163_p2), 146432  }
   0x7   : > { %s754_s23 = smov (!%p163_p2), 17   ;;  %s755_s24 = smov (!%p163_p2), 19   ;;  %707 = vmatprep.mubr.msk.bf16.mxu1 (!%p163_p2), %vm443_vm0, %v848_v7  ;;  %740 = vset.pattern.permute.xlu1 (!%p163_p2), %v763_v6  ;;  %vm223_vm2 = vcmask (!%p163_p2), 154624   ;;  %vm253_vm3 = vcmask (!%p163_p2), 138240   ;;  %vm359_vm4 = vcmask (!%p163_p2), 1041408   ;;  %vm268_vm5 = vcmask (!%p163_p2), 7168  }
   0x8   : > { %s756_s25 = smov (!%p163_p2), 77   ;;  %s757_s26 = smov (!%p163_p2), 1   ;;  %vm368_vm6 = vcmask (!%p163_p2), 1043456   ;;  %vm375_vm7 = vcmask (!%p163_p2), 1045504   ;;  %vm281_vm8 = vcmask (!%p163_p2), 1039360   ;;  %vm296_vm9 = vcmask (!%p163_p2), 908288  }
   0x9   : > { %s758_s27 = smov (!%p163_p2), 61   ;;  %s759_s28 = smov (!%p163_p2), 79   ;;  %vm311_vm10 = vcmask (!%p163_p2), 900096   ;;  %vm286_vm11 = vcmask (!%p163_p2), 547840   ;;  %vm301_vm12 = vcmask (!%p163_p2), 416768   ;;  %vm326_vm13 = vcmask (!%p163_p2), 891904  }
   0xa   : > { %s760_s29 = smov (!%p163_p2), 127   ;;  %s761_s30 = smov (!%p163_p2), 111   ;;  %vm316_vm14 = vcmask (!%p163_p2), 408576   ;;  %vm331_vm15 = vcmask (!%p163_p2), 400384  }
   0xb   : > { %s762_s5 = smov (!%p163_p2), 110   ;;  %s764_s8 = smov (!%p163_p2), 67  }
   0xc   : > { %s765_s9 = smov (!%p163_p2), 109   ;;  %s766_s10 = smov (!%p163_p2), 51  }
   0xd   : > { %s969_s16 = smov (!%p188_p3, %s680_s16), 1  ;;  %s767_s11 = smov 49  }
   0xe   : > { %s712_s17 = smul.u32 12, %s969_s16  ;;  %s768_s12 = smov 50  }
  0x10   : > { %s192_s20 = scalar_lea.vmem %s964_s1, %s712_s17 }
  0x11   : > { %v201_v0 = vld [vmem:[%s192_s20 + $0x8] sm:$0xf]  ;;  %v200_v1 = vld [vmem:[%s192_s20] sm:$0xff] }
  0x12   : > { %v808_v2 = vpack.c.bf16 %v201_v0, %v201_v0  ;;  %v810_v3 = vpack.c.bf16 %v200_v1, %v200_v1  ;;  %v207_v4 = vcombine.high %v200_v1, %v200_v1 }
  0x14   : > { %230 = vrot.lane.b32.xlu1 %v808_v2, %s752_s21  ;;  %232 = vrot.lane.b32.xlu0 %v810_v3, %s753_s22  ;;  %v815_v5 = vpack.c.bf16 %v207_v4, %v207_v4 }
  0x18   : > { %247 = vrot.lane.b32.xlu1 %v810_v3, %s754_s23  ;;  %234 = vrot.lane.b32.xlu0 %v815_v5, %s753_s22 }
  0x1c   : > { %217 = vrot.lane.b32.xlu1 %v810_v3, %s755_s24  ;;  %249 = vrot.lane.b32.xlu0 %v815_v5, %s754_s23 }
  0x20   : > { %245 = vrot.lane.b32.xlu1 %v808_v2, %s756_s25  ;;  %219 = vrot.lane.b32.xlu0 %v815_v5, %s755_s24 }
  0x24   : > { %264 = vrot.lane.b32.xlu1 %v815_v5, %s757_s26  ;;  %262 = vrot.lane.b32.xlu0 %v810_v3, %s757_s26 }
  0x28   : > { %260 = vrot.lane.b32.xlu1 %v808_v2, %s758_s27  ;;  %213 = vrot.lane.b32.xlu0 %v808_v2, %s759_s28  ;;  %s713_s27 = smul.u32 96, %s969_s16 }
  0x2c   : > { %279 = vrot.lane.b32.xlu1 %v808_v2, %s760_s29  ;;  %277 = vrot.lane.b32.xlu0 %v815_v5, %s760_s29 }
  0x30   : > { %292 = vrot.lane.b32.xlu1 %v815_v5, %s761_s30  ;;  %275 = vrot.lane.b32.xlu0 %v810_v3, %s760_s29 }
  0x34   : > { %290 = vrot.lane.b32.xlu1 %v810_v3, %s761_s30  ;;  %294 = vrot.lane.b32.xlu0 %v808_v2, %s761_s30  ;;  %s942_s30 = scalar_lea.vmem %s967_s4, %s713_s27 }
  0x38   : > { %309 = vrot.lane.b32.xlu1 %v808_v2, %s762_s5  ;;  %307 = vrot.lane.b32.xlu0 %v815_v5, %s762_s5 }
  0x3c   : > { %236 = vrot.lane.b32.xlu1 %v808_v2, %s753_s22  ;;  %305 = vrot.lane.b32.xlu0 %v810_v3, %s762_s5 }
  0x40   : > { %221 = vrot.lane.b32.xlu1 %v808_v2, %s755_s24  ;;  %251 = vrot.lane.b32.xlu0 %v808_v2, %s754_s23 }
  0x44   : > { %284 = vrot.lane.b32.xlu1 %v810_v3, %s764_s8  ;;  %266 = vrot.lane.b32.xlu0 %v808_v2, %s757_s26 }
  0x48   : > { %320 = vrot.lane.b32.xlu1 %v810_v3, %s765_s9  ;;  %299 = vrot.lane.b32.xlu0 %v810_v3, %s766_s10 }
  0x4c   : > { %324 = vrot.lane.b32.xlu1 %v808_v2, %s765_s9  ;;  %322 = vrot.lane.b32.xlu0 %v815_v5, %s765_s9 }
  0x50   : > { %329 = vrot.lane.b32.xlu1 %v810_v3, %s767_s11  ;;  %314 = vrot.lane.b32.xlu0 %v810_v3, %s768_s12 }
  0x54   : > { %415 = vperm.xlu0 %739, %v409_v8   ;;  %420 = vperm.xlu1 %740, %v410_v9  }
  0x58   : > { %425 = vperm.xlu1 %740, %v411_v10   ;;  %430 = vperm.xlu0 %739, %v412_v11  }
  0x86   : > { %v231_v12 = vpop.permute.xlu1 %230  ;;  %v233_v13 = vpop.permute.xlu0 %232 }
  0x87   : > { %v244_v27 = vsel %vm238_vm1, %v231_v12, %v233_v13 }
  0x88   : > { %v336_v33 = vrot.slane %v244_v27, 6 }
  0x8a   : > { %v248_v14 = vpop.permute.xlu1 %247  ;;  %v874_v15 = vpop.permute.xlu0 %234 }
  0x8b   : > { %v239_v18 = vsel %vm238_vm1, %v233_v13, %v874_v15 }
  0x8c   : > { %v337_v22 = vrot.slane %v239_v18, 6 }
  0x8e   : > { %v218_v16 = vpop.permute.xlu1 %217  ;;  %v876_v17 = vpop.permute.xlu0 %249 }
  0x8f   : > { %v254_v23 = vsel %vm253_vm3, %v248_v14, %v876_v17 }
  0x90   : > { %v341_v28 = vrot.slane %v254_v23, 4 }
  0x92   : > { %v246_v19 = vpop.permute.xlu1 %245  ;;  %v880_v20 = vpop.permute.xlu0 %219 }
  0x93   : > { %v224_v21 = vsel %vm223_vm2, %v218_v16, %v880_v20  ;;  %v259_v30 = vsel %vm253_vm3, %v246_v19, %v248_v14 }
  0x94   : > { %v364_v24 = vsel %vm359_vm4, %v224_v21, %v337_v22  ;;  %v340_v37 = vrot.slane %v259_v30, 4 }
  0x95   : > { %v372_v32 = vsel %vm368_vm6, %v364_v24, %v341_v28 }
  0x96   : > { %v887_v25 = vpop.permute.xlu1 %264  ;;  %v263_v26 = vpop.permute.xlu0 %262 }
  0x97   : > { %v269_v29 = vsel %vm268_vm5, %v263_v26, %v887_v25 }
  0x98   : > { %v345_v31 = vrot.slane %v269_v29, 2 }
  0x9a   : > { %v261_v34 = vpop.permute.xlu1 %260  ;;  %v214_v35 = vpop.permute.xlu0 %213  ;;  %v380_v36 = vsel %vm375_vm7, %v372_v32, %v345_v31 }
  0x9b   : > { %v274_v38 = vsel %vm268_vm5, %v261_v34, %v263_v26  ;;  %v229_v39 = vsel %vm223_vm2, %v214_v35, %v218_v16  ;;  %458 = vmatprep.subr.bf16.mxu0 %v380_v36 }
  0x9c   : > { %v344_v40 = vrot.slane %v274_v38, 2  ;;  %v361_v41 = vsel %vm359_vm4, %v229_v39, %v336_v33 }
  0x9d   : > { %v370_v42 = vsel %vm368_vm6, %v361_v41, %v340_v37 }
  0x9e   : > { %v280_v43 = vpop.permute.xlu1 %279  ;;  %v278_v44 = vpop.permute.xlu0 %277  ;;  %v377_v45 = vsel %vm375_vm7, %v370_v42, %v344_v40 }
  0x9f   : > { %459 = vmatpush1.bf16.msra.mxu0 %v377_v45  ;;  %v283_v48 = vsel %vm281_vm8, %v278_v44, %v280_v43 }
  0xa0   : > { %v349_v52 = vrot.slane %v283_v48, 6  ;;  %v199_v48 = vld [vmem:[%s963_s0] sm:$0x7] }
  0xa2   : > { %v293_v46 = vpop.permute.xlu1 %292  ;;  %v276_v47 = vpop.permute.xlu0 %275  ;;  %v390_v61 = vsel %vm359_vm4, %v815_v5, %v349_v52 }
  0xa3   : > { %v282_v53 = vsel %vm281_vm8, %v276_v47, %v278_v44  ;;  %v743_v44 = vld [vmem:[%s965_s2 + $0x8] sm:$0xff]  }
  0xa4   : > { %v348_v59 = vrot.slane %v282_v53, 6 }
  0xa6   : > { %v291_v49 = vpop.permute.xlu1 %290  ;;  %v295_v50 = vpop.permute.xlu0 %294  ;;  %v387_v10 = vsel %vm359_vm4, %v810_v3, %v348_v59 }
  0xa7   : > { %v298_v51 = vsel %vm296_vm9, %v293_v46, %v295_v50  ;;  %v297_v55 = vsel %vm296_vm9, %v291_v49, %v293_v46 }
  0xa8   : > { %v353_v54 = vrot.slane %v298_v51, 4  ;;  %v352_v62 = vrot.slane %v297_v55, 4 }
  0xaa   : > { %v310_v56 = vpop.permute.xlu1 %309  ;;  %v308_v57 = vpop.permute.xlu0 %307  ;;  %v397_v63 = vsel %vm368_vm6, %v390_v61, %v353_v54  ;;  %v395_v12 = vsel %vm368_vm6, %v387_v10, %v352_v62 }
  0xab   : > { %v313_v58 = vsel %vm311_vm10, %v308_v57, %v310_v56 }
  0xac   : > { %v357_v60 = vrot.slane %v313_v58, 2 }
  0xae   : > { %v237_v0 = vpop.permute.xlu1 %236  ;;  %v306_v1 = vpop.permute.xlu0 %305  ;;  %v404_v4 = vsel %vm375_vm7, %v397_v63, %v357_v60 }
  0xaf   : > { %v312_v8 = vsel %vm311_vm10, %v306_v1, %v308_v57  ;;  %460 = vmatprep.subr.bf16.mxu0 %v404_v4  ;;  %v240_v11 = vsel %vm238_vm1, %v874_v15, %v237_v0 }
  0xb0   : > { %v356_v9 = vrot.slane %v312_v8, 2  ;;  %v338_v19 = vrot.slane %v240_v11, 6 }
  0xb2   : > { %v222_v13 = vpop.permute.xlu1 %221  ;;  %v252_v5 = vpop.permute.xlu0 %251  ;;  %v401_v14 = vsel %vm375_vm7, %v395_v12, %v356_v9 }
  0xb3   : > { %v225_v16 = vsel %vm223_vm2, %v880_v20, %v222_v13  ;;  %v255_v18 = vsel %vm253_vm3, %v876_v17, %v252_v5  ;;  %461 = vmatpush1.bf16.msra.mxu0 %v401_v14 }
  0xb4   : > { %v342_v21 = vrot.slane %v255_v18, 4  ;;  %v367_v3 = vsel %vm359_vm4, %v225_v16, %v338_v19 }
  0xb6   : > { %v285_v22 = vpop.permute.xlu1 %284  ;;  %v267_v23 = vpop.permute.xlu0 %266  ;;  %v374_v26 = vsel %vm368_vm6, %v367_v3, %v342_v21 }
  0xb7   : > { %v270_v15 = vsel %vm268_vm5, %v887_v25, %v267_v23  ;;  %v289_v17 = vsel %vm286_vm11, %v280_v43, %v285_v22 }
  0xb8   : > { %v346_v24 = vrot.slane %v270_v15, 2  ;;  %v350_v34 = vrot.slane %v289_v17, 6 }
  0xba   : > { %v321_v27 = vpop.permute.xlu1 %320  ;;  %v300_v28 = vpop.permute.xlu0 %299  ;;  %v383_v20 = vsel %vm375_vm7, %v374_v26, %v346_v24  ;;  %v393_v39 = vsel %vm359_vm4, %v808_v2, %v350_v34 }
  0xbb   : > { %701 = vmatprep.subr.bf16.mxu1 %v383_v20  ;;  %v304_v29 = vsel %vm301_vm12, %v295_v50, %v300_v28 }
  0xbc   : > { %702 = vmatpush3.bf16.msra.mxu1 %v383_v20  ;;  %v354_v35 = vrot.slane %v304_v29, 4 }
  0xbe   : > { %v325_v30 = vpop.permute.xlu1 %324  ;;  %v323_v31 = vpop.permute.xlu0 %322  ;;  %v399_v41 = vsel %vm368_vm6, %v393_v39, %v354_v35 }
  0xbf   : > { %v327_v32 = vsel %vm326_vm13, %v321_v27, %v323_v31  ;;  %v328_v33 = vsel %vm326_vm13, %v323_v31, %v325_v30 }
  0xc0   : > { %689 = vmatprep.subr.msk.bf16.mxu0 %vm359_vm4, %v328_v33  ;;  %v451_v25 = vsel %vm359_vm4, %v327_v32, 0 }
  0xc1   : > { %463 = vmatpush1.bf16.msra.mxu0 %v451_v25 }
  0xc2   : > { %v315_v36 = vpop.permute.xlu0 %314  ;;  %v330_v40 = vpop.permute.xlu1 %329 }
  0xc3   : > { %v319_v37 = vsel %vm316_vm14, %v310_v56, %v315_v36  ;;  %v334_v43 = vsel %vm331_vm15, %v325_v30, %v330_v40 }
  0xc4   : > { %v358_v38 = vrot.slane %v319_v37, 2  ;;  %690 = vmatmul.mubr.msk.bf16.vlgmr.msra.gmra.mrb[0].mxu0 %vm443_vm0, %v848_v7  ;;  %v456_v2 = vsel %vm359_vm4, %v334_v43, 0 }
  0xc5   : > { %500 = vmatprep.mubr.bf16.mxu0 %v763_v6  ;;  %v585_v6 = vlaneseq }
  0xc6   : > { %v407_v42 = vsel %vm375_vm7, %v399_v41, %v358_v38 }
  0xc7   : > { %703 = vmatprep.subr.bf16.mxu1 %v407_v42  ;;  %v586_v7 = vshrl.u32 %v585_v6, 7 }
  0xc8   : > { %704 = vmatpush3.bf16.msra.mxu1 %v407_v42 }
  0xc9   : > { %711 = vmatprep.subr.msk.bf16.mxu1 %vm359_vm4, %v334_v43  ;;  %v587_v46 = vsub.s32 0, %v586_v7  ;;  %v591_v49 = vsub.s32 1, %v586_v7  ;;  %v595_v18 = vsub.s32 2, %v586_v7 }
  0xcb   : > { %v588_v55 = vrot.slane %v199_v48, %v587_v46  ;;  %v592_v59 = vrot.slane %v199_v48, %v591_v49  ;;  %v596_v30 = vrot.slane %v199_v48, %v595_v18 }
  0xcc   : > { %691 = vmatmul.mubr.msk.bf16.gmra.mrb[4].mxu0 %vm443_vm0, %v743_v44  ;;  %706 = vmatpush3.bf16.msra.mxu1 %v456_v2 }
  0xcf   : > { %708 = vmatmul.mubr.msk.bf16.vlgmr.msra.gmra.mrb[0].mxu1 %vm443_vm0, %v743_v44  ;;  %vm614_vm0 = vcmask 556032  }
  0xd3   : > { %v416_v45 = vpop.permute.xlu0 %415  ;;  %v421_v50 = vpop.permute.xlu1 %420 }
  0xd7   : > { %v426_v4 = vpop.permute.xlu1 %425  ;;  %v431_v13 = vpop.permute.xlu0 %430 }
 0x197   : > { %v492_v47 = vpop.f32.mrb[0].mxu0 }
 0x198   : > { %v494_v51 = vpop.f32.mrb[1].mxu0  ;;  %v493_v52 = vadd.f32 %v492_v47, %v416_v45 }
 0x199   : > { %v495_v53 = vadd.f32 %v494_v51, %v416_v45  ;;  %v496_v54 = vpop.f32.mrb[2].mxu0 }
 0x19a   : > { %v560_v56 = vmul.f32 0.1, %v493_v52  ;;  %v497_v57 = vadd.f32 %v496_v54, %v421_v50  ;;  %v498_v58 = vpop.f32.mrb[3].mxu0 }
 0x19b   : > { %v561_v60 = vmul.f32 0.1, %v495_v53  ;;  %v499_v61 = vadd.f32 %v498_v58, %v421_v50 }
 0x19c   : > { %v572_v62 = vmax.f32 %v493_v52, %v560_v56  ;;  %v563_v63 = vmul.f32 0.1, %v497_v57 }
 0x19d   : > { %v573_v0 = vmax.f32 %v495_v53, %v561_v60  ;;  %v564_v1 = vmul.f32 0.1, %v499_v61 }
 0x19e   : > { %v600_v8 = vmul.f32 %v588_v55, %v572_v62  ;;  %v575_v9 = vmax.f32 %v497_v57, %v563_v63 }
 0x19f   : > { %v601_v10 = vmul.f32 %v592_v59, %v573_v0  ;;  %v576_v11 = vmax.f32 %v499_v61, %v564_v1  ;;  %v502_v12 = vpop.f32.mrb[4].mxu0 }
 0x1a0   : > { %612 = vst [vmem:[%s942_s30] sm:$0xff] %v600_v8  ;;  %v603_v5 = vmul.f32 %v588_v55, %v575_v9  ;;  %v503_v14 = vadd.f32 %v502_v12, %v426_v4  ;;  %v504_v16 = vpop.f32.mrb[5].mxu0 }
 0x1a1   : > { %613 = vst [vmem:[%s942_s30 + $0x8] sm:$0xff] %v601_v10  ;;  %v604_v19 = vmul.f32 %v592_v59, %v576_v11  ;;  %v505_v21 = vadd.f32 %v504_v16, %v426_v4  ;;  %v506_v3 = vpop.f32.mrb[6].mxu0 }
 0x1a2   : > { %616 = vst [vmem:[%s942_s30 + $0x18] sm:$0xff] %v603_v5  ;;  %v566_v22 = vmul.f32 0.1, %v503_v14  ;;  %v507_v23 = vadd.f32 %v506_v3, %v431_v13  ;;  %v508_v15 = vpop.f32.mrb[7].mxu0  ;;  %v709_v24 = vpop.f32.mrb[0].mxu1 }
 0x1a3   : > { %617 = vst [vmem:[%s942_s30 + $0x20] sm:$0xff] %v604_v19  ;;  %v567_v26 = vmul.f32 0.1, %v505_v21  ;;  %v509_v27 = vadd.f32 %v508_v15, %v431_v13  ;;  %v554_v28 = vadd.f32 %v709_v24, %v426_v4  ;;  %v545_v20 = vpop.f32.mrb[1].mxu1 }
 0x1a4   : > { %v578_v17 = vmax.f32 %v503_v14, %v566_v22  ;;  %v569_v29 = vmul.f32 0.1, %v507_v23  ;;  %v546_v31 = vadd.f32 %v545_v20, %v416_v45  ;;  %v710_v32 = vpop.f32.mrb[2].mxu1 }
 0x1a5   : > { %v579_v33 = vmax.f32 %v505_v21, %v567_v26  ;;  %v570_v34 = vmul.f32 0.1, %v509_v27  ;;  %v568_v25 = vmul.f32 0.1, %v554_v28  ;;  %v557_v35 = vadd.f32 %v710_v32, %v431_v13  ;;  %v548_v36 = vpop.f32.mrb[3].mxu1 }
 0x1a6   : > { %v606_v37 = vmul.f32 %v588_v55, %v578_v17  ;;  %v581_v38 = vmax.f32 %v507_v23, %v569_v29  ;;  %v562_v39 = vmul.f32 0.1, %v546_v31  ;;  %v549_v40 = vadd.f32 %v548_v36, %v421_v50 }
 0x1a7   : > { %v607_v41 = vmul.f32 %v592_v59, %v579_v33  ;;  %v582_v42 = vmax.f32 %v509_v27, %v570_v34  ;;  %v580_v43 = vmax.f32 %v554_v28, %v568_v25  ;;  %v571_v44 = vmul.f32 0.1, %v557_v35 }
 0x1a8   : > { %619 = vst [vmem:[%s942_s30 + $0x30] sm:$0xff] %v606_v37  ;;  %v609_v2 = vmul.f32 %v588_v55, %v581_v38  ;;  %v574_v6 = vmax.f32 %v546_v31, %v562_v39  ;;  %v565_v7 = vmul.f32 0.1, %v549_v40 }
 0x1a9   : > { %620 = vst [vmem:[%s942_s30 + $0x38] sm:$0xff] %v607_v41  ;;  %v610_v45 = vmul.f32 %v592_v59, %v582_v42  ;;  %v608_v46 = vmul.f32 %v596_v30, %v580_v43  ;;  %v583_v47 = vmax.f32 %v557_v35, %v571_v44 }
 0x1aa   : > { %622 = vst [vmem:[%s942_s30 + $0x48] sm:$0xff] %v609_v2  ;;  %v602_v48 = vmul.f32 %v596_v30, %v574_v6  ;;  %v577_v49 = vmax.f32 %v549_v40, %v565_v7 }
 0x1ab   : > { %623 = vst [vmem:[%s942_s30 + $0x50] sm:$0xff] %v610_v45  ;;  %621 = vst.msk [vmem:[%s942_s30 + $0x40] sm:$0xff] %vm614_vm0, %v608_v46  ;;  %v611_v50 = vmul.f32 %v596_v30, %v583_v47 }
 0x1ac   : > { %615 = vst.msk [vmem:[%s942_s30 + $0x10] sm:$0xff] %vm614_vm0, %v602_v48  ;;  %v605_v51 = vmul.f32 %v596_v30, %v577_v49 }
 0x1ad   : > { %624 = vst.msk [vmem:[%s942_s30 + $0x58] sm:$0xff] %vm614_vm0, %v611_v50 }
 0x1ae   : > { %618 = vst.msk [vmem:[%s942_s30 + $0x28] sm:$0xff] %vm614_vm0, %v605_v51 }
 0x1af PF: > { %s14_s15 = sadd.s32 1, %s750_s15  }
 0x1b0   : > { %p11_p4 = scmp.ge.s32.totalorder %s14_s15, 4  }
 0x1b2   :  { %13 = sbr.rel (!%p11_p4) target bundleno = 1 (0x1), region = 66 }

// kernel: conv_residual_blocks_forward.3
= control target key start
LH: loop header
LB: loop body
LE: loop exit
PB: predicated region body
PF: predicated region fallthrough
CT: control target
= control target key end

     0   :  { %s2006_s21 = smov 0   ;;  %s2008_s22 = smov 0   ;;  %s2656_s0 = inlined_call_operand.vmem [shape: f32[1,324], index: 0, kind: input, shape index: {}]   ;;  %s2657_s1 = inlined_call_operand.vmem [shape: f32[2,32,324], index: 1, kind: input, shape index: {}]   ;;  %s2658_s2 = inlined_call_operand.vmem [shape: bf16[2,32,288], index: 2, kind: input, shape index: {}]   ;;  %s2659_s3 = inlined_call_operand.vmem [shape: f32[2,32,1], index: 3, kind: input, shape index: {}]   ;;  %s2660_s4 = inlined_call_operand.vmem [shape: bf16[2,32,288], index: 4, kind: input, shape index: {}]   ;;  %s2661_s5 = inlined_call_operand.vmem [shape: f32[2,32,1], index: 5, kind: input, shape index: {}]   ;;  %s2662_s6 = inlined_call_operand.vmem [shape: f32[2,32,324], index: 6, kind: output, shape index: {}]  }
   0x1   :  { %s2010_s23 = smov 0   ;;  %s2012_s24 = smov 0  }
   0x2   :  { %s2014_s25 = smov 0  }
   0x3 LB: > { %s25_s26 = sadd.s32 1, %s1944_s23  ;;  %s28_s27 = sadd.s32 1, %s1948_s24  ;;  %s1952_s25 = sphi %s2014_s25, %s16_s25   ;;  %s1948_s24 = sphi %s2012_s24, %s2672_s24   ;;  %s1944_s23 = sphi %s2010_s23, %s2671_s23   ;;  %s1940_s22 = sphi %s2008_s22, %s2670_s22   ;;  %s1936_s21 = sphi %s2006_s21, %s2669_s21  }
   0x4   : > { %p26_p0 = scmp.ge.s32.totalorder %s25_s26, 2  ;;  %p1679_p1 = scmp.ge.s32.totalorder %s1952_s25, 1 }
   0x5   : > { %p264_p2 = scmp.lt.s32.totalorder %s1952_s25, 5 }
   0x6   : > { %s2674_s26 = smov (%p26_p0, %s25_s26), 0  ;;  %s2676_s27 = smov (!%p26_p0, %s28_s27), %s1948_s24 }
   0x7   : > { %p265_p3 = pnand %p1679_p1, %p264_p2  ;;  %p30_p4 = scmp.ge.s32.totalorder %s2676_s27, 2 }
   0x8   : > { %p314_p5 = scmp.lt.s32.totalorder (!%p265_p3), %s1940_s22, 1  ;;  %p319_p6 = scmp.lt.s32.totalorder (!%p265_p3), %s1936_s21, 1 }
   0x9   : > { %s2678_s27 = smov (%p30_p4, %s2676_s27), 0  ;;  %268 = sbr.rel (%p265_p3) target bundleno = 979 (0x3d3), region = 44 }
   0xa   : > { %p1688_p7 = scmp.ne.s32.totalorder (!%p265_p3), %s1936_s21, 0 }
  0x10   : > { %s2680_s22 = smov (!%p314_p5, %s1940_s22), 1  ;;  %348 = sbr.rel (%p1688_p7) target bundleno = 29 (0x1d), region = 48 }
  0x11   : > { %s320_s28 = scalar_select %p319_p6, %s1936_s21, 1 }
  0x12   : > { %s1825_s29 = smul.u32 96, %s2680_s22  ;;  %vm363_vm0 = vcmask (!%p1688_p7), 556032  }
  0x13   : > { %s1826_s30 = smul.u32 48, %s320_s28  ;;  %s1711_s7 = sshll.u32 %s320_s28, 5 }
  0x14   : > { %s318_s10 = scalar_lea.vmem %s2657_s1, %s1825_s29  ;;  %s2046_s13 = scalar_lea.vmem %s2659_s3, %s1711_s7 }
  0x15   : > { %s2051_s16 = scalar_lea.vmem %s2658_s2, %s1826_s30  ;;  %s2056_s19 = scalar_lea.vmem %s2660_s4, %s1826_s30  ;;  %v349_v0 = vld [vmem:[%s318_s10] sm:$0xff] (!%p1688_p7)  ;;  %v350_v1 = vld [vmem:[%s318_s10 + $0x8] sm:$0xff] (!%p1688_p7)  ;;  %v351_v2 = vld [vmem:[%s318_s10 + $0x10] sm:$0xff] (!%p1688_p7) }
  0x16   : > { %s2061_s28 = scalar_lea.vmem %s2661_s5, %s1711_s7  ;;  %s2066_s11 = scalar_lea.vmem %s2662_s6, %s1825_s29  ;;  %v352_v3 = vld [vmem:[%s318_s10 + $0x18] sm:$0xff] (!%p1688_p7)  ;;  %v353_v4 = vld [vmem:[%s318_s10 + $0x20] sm:$0xff] (!%p1688_p7)  ;;  %v354_v5 = vld [vmem:[%s318_s10 + $0x28] sm:$0xff] (!%p1688_p7) }
  0x17   : > { %361 = vst [vmem:[%s2066_s11] sm:$0xff] %v349_v0  ;;  %362 = vst [vmem:[%s2066_s11 + $0x8] sm:$0xff] %v350_v1  ;;  %v355_v6 = vld [vmem:[%s318_s10 + $0x30] sm:$0xff]  ;;  %v356_v7 = vld [vmem:[%s318_s10 + $0x38] sm:$0xff] }
  0x18   : > { %364 = vst.msk [vmem:[%s2066_s11 + $0x10] sm:$0xff] %vm363_vm0, %v351_v2  ;;  %365 = vst [vmem:[%s2066_s11 + $0x18] sm:$0xff] %v352_v3  ;;  %v357_v8 = vld [vmem:[%s318_s10 + $0x40] sm:$0xff]  ;;  %v358_v9 = vld [vmem:[%s318_s10 + $0x48] sm:$0xff] }
  0x19   : > { %366 = vst [vmem:[%s2066_s11 + $0x20] sm:$0xff] %v353_v4  ;;  %367 = vst.msk [vmem:[%s2066_s11 + $0x28] sm:$0xff] %vm363_vm0, %v354_v5  ;;  %v359_v10 = vld [vmem:[%s318_s10 + $0x50] sm:$0xff]  ;;  %v360_v11 = vld [vmem:[%s318_s10 + $0x58] sm:$0xff] }
  0x1a   : > { %368 = vst [vmem:[%s2066_s11 + $0x30] sm:$0xff] %v355_v6  ;;  %369 = vst [vmem:[%s2066_s11 + $0x38] sm:$0xff] %v356_v7 }
  0x1b   : > { %370 = vst.msk [vmem:[%s2066_s11 + $0x40] sm:$0xff] %vm363_vm0, %v357_v8  ;;  %371 = vst [vmem:[%s2066_s11 + $0x48] sm:$0xff] %v358_v9 }
  0x1c   : > { %372 = vst [vmem:[%s2066_s11 + $0x50] sm:$0xff] %v359_v10  ;;  %373 = vst.msk [vmem:[%s2066_s11 + $0x58] sm:$0xff] %vm363_vm0, %v360_v11 }
  0x1d PF: > { %s1954_s21 = smov 79   ;;  %s1955_s29 = smov 19   ;;  %v1888_v30 = vld [vmem:[%s2051_s16 + $0x4] ss:$12 sps:$4 sm:$0xff]   ;;  %v1969_v31 = vmov 0   ;;  %vm423_vm1 = vcmask 154624  }
  0x1e   : > { %s1956_s30 = smov 18   ;;  %s1957_s7 = smov 78   ;;  %772 = vmatprep.mubr.bf16.mxu0 %v1888_v30  ;;  %878 = vmatprep.mubr.bf16.mxu1 %v1888_v30  ;;  %vm457_vm2 = vcmask 146432   ;;  %v680_v42 = vld [vmem:[%s2046_s13 + $0x8] sm:$0xff]  ;;  %v679_v44 = vld [vmem:[%s2046_s13] sm:$0xff]  ;;  %v681_v47 = vld [vmem:[%s2046_s13 + $0x10] sm:$0xff] }
  0x1f   : > { %v377_v12 = vld [vmem:[%s2066_s11 + $0x10] sm:$0xff]  ;;  %v378_v16 = vld [vmem:[%s2066_s11 + $0x18] sm:$0xff]  ;;  %s1958_s10 = smov 17   ;;  %s1959_s12 = smov 77   ;;  %1884 = vset.pattern.permute.xlu0 %v1969_v31  ;;  %1885 = vset.pattern.permute.xlu1 %v1969_v31  ;;  %vm491_vm3 = vcmask 138240   ;;  %vm525_vm4 = vcmask 7168  }
  0x20   : > { %v380_v13 = vld [vmem:[%s2066_s11 + $0x28] sm:$0xff]  ;;  %v379_v21 = vld [vmem:[%s2066_s11 + $0x20] sm:$0xff]  ;;  %s1960_s14 = smov 1   ;;  %s1961_s15 = smov 61   ;;  %v682_v49 = vld [vmem:[%s2046_s13 + $0x18] sm:$0xff]  ;;  %vm555_vm5 = vcmask 1039360  }
  0x21   : > { %v2088_v15 = vpack.c.bf16 %v380_v13, %v377_v12  ;;  %v381_v17 = vld [vmem:[%s2066_s11 + $0x30] sm:$0xff]  ;;  %v382_v25 = vld [vmem:[%s2066_s11 + $0x38] sm:$0xff]  ;;  %s1962_s17 = smov 127   ;;  %s1963_s18 = smov 67   ;;  %vm568_vm6 = vcmask 547840   ;;  %vm589_vm7 = vcmask 908288  }
  0x22   : > { %v384_v18 = vld [vmem:[%s2066_s11 + $0x48] sm:$0xff]  ;;  %v383_v22 = vld [vmem:[%s2066_s11 + $0x40] sm:$0xff]  ;;  %s1964_s20 = smov 111   ;;  %s2663_s22 = smov 51   ;;  %vm602_vm8 = vcmask 416768   ;;  %vm623_vm9 = vcmask 900096  }
  0x23   : > { %403 = vrot.lane.b32.xlu1 %v2088_v15, %s1954_s21  ;;  %v2100_v23 = vpack.c.bf16 %v384_v18, %v381_v17  ;;  %v386_v24 = vld [vmem:[%s2066_s11 + $0x58] sm:$0xff]  ;;  %v385_v26 = vld [vmem:[%s2066_s11 + $0x50] sm:$0xff]  ;;  %1713 = vmatprep.subr.bf16.mxu1 %v2088_v15  ;;  %s1966_s8 = smov 110   ;;  %s2665_s9 = smov 50   ;;  %vm636_vm10 = vcmask 408576   ;;  %vm657_vm11 = vcmask 891904  }
  0x24   : > { %v375_v14 = vld [vmem:[%s2066_s11] sm:$0xff]  ;;  %v376_v20 = vld [vmem:[%s2066_s11 + $0x8] sm:$0xff]  ;;  %v2112_v28 = vpack.c.bf16 %v386_v24, %v383_v22  ;;  %v2116_v29 = vpack.c.bf16 %v385_v26, %v382_v25  ;;  %vm733_vm12 = vcmask 261120   ;;  %vm670_vm13 = vcmask 400384  }
  0x25   : > { %v2093_v19 = vpack.c.bf16 %v378_v16, %v375_v14  ;;  %v2108_v27 = vpack.c.bf16 %v379_v21, %v376_v20  ;;  %vm1550_vm14 = vcmask 556032  }
  0x27   : > { %411 = vrot.lane.b32.xlu0 %v2093_v19, %s1955_s29  ;;  %417 = vrot.lane.b32.xlu1 %v2100_v23, %s1955_s29 }
  0x2b   : > { %413 = vrot.lane.b32.xlu0 %v2108_v27, %s1955_s29  ;;  %405 = vrot.lane.b32.xlu1 %v2112_v28, %s1954_s21 }
  0x2f   : > { %419 = vrot.lane.b32.xlu0 %v2116_v29, %s1955_s29  ;;  %447 = vrot.lane.b32.xlu1 %v2108_v27, %s1956_s30 }
  0x33   : > { %445 = vrot.lane.b32.xlu0 %v2093_v19, %s1956_s30  ;;  %451 = vrot.lane.b32.xlu1 %v2100_v23, %s1956_s30 }
  0x37   : > { %441 = vrot.lane.b32.xlu0 %v2088_v15, %s1957_s7  ;;  %443 = vrot.lane.b32.xlu1 %v2112_v28, %s1957_s7 }
  0x3b   : > { %453 = vrot.lane.b32.xlu0 %v2116_v29, %s1956_s30  ;;  %481 = vrot.lane.b32.xlu1 %v2108_v27, %s1958_s10 }
  0x3f   : > { %479 = vrot.lane.b32.xlu0 %v2093_v19, %s1958_s10  ;;  %485 = vrot.lane.b32.xlu1 %v2100_v23, %s1958_s10 }
  0x43   : > { %475 = vrot.lane.b32.xlu0 %v2088_v15, %s1959_s12  ;;  %477 = vrot.lane.b32.xlu1 %v2112_v28, %s1959_s12 }
  0x47   : > { %487 = vrot.lane.b32.xlu0 %v2116_v29, %s1958_s10  ;;  %515 = vrot.lane.b32.xlu1 %v2108_v27, %s1960_s14 }
  0x4b   : > { %513 = vrot.lane.b32.xlu0 %v2093_v19, %s1960_s14  ;;  %519 = vrot.lane.b32.xlu1 %v2100_v23, %s1960_s14 }
  0x4f   : > { %509 = vrot.lane.b32.xlu0 %v2088_v15, %s1961_s15  ;;  %511 = vrot.lane.b32.xlu1 %v2112_v28, %s1961_s15 }
  0x53   : > { %521 = vrot.lane.b32.xlu0 %v2116_v29, %s1960_s14  ;;  %545 = vrot.lane.b32.xlu1 %v2108_v27, %s1962_s17 }
  0x57   : > { %415 = vrot.lane.b32.xlu0 %v2088_v15, %s1955_s29  ;;  %543 = vrot.lane.b32.xlu1 %v2093_v19, %s1962_s17 }
  0x5b   : > { %547 = vrot.lane.b32.xlu0 %v2088_v15, %s1962_s17  ;;  %551 = vrot.lane.b32.xlu1 %v2116_v29, %s1962_s17 }
  0x5f   : > { %421 = vrot.lane.b32.xlu0 %v2112_v28, %s1955_s29  ;;  %549 = vrot.lane.b32.xlu1 %v2100_v23, %s1962_s17 }
  0x63   : > { %553 = vrot.lane.b32.xlu0 %v2112_v28, %s1962_s17  ;;  %449 = vrot.lane.b32.xlu1 %v2088_v15, %s1956_s30 }
  0x67   : > { %564 = vrot.lane.b32.xlu0 %v2093_v19, %s1963_s18  ;;  %581 = vrot.lane.b32.xlu1 %v2088_v15, %s1964_s20 }
  0x6b   : > { %579 = vrot.lane.b32.xlu0 %v2108_v27, %s1964_s20  ;;  %577 = vrot.lane.b32.xlu1 %v2093_v19, %s1964_s20 }
  0x6f   : > { %566 = vrot.lane.b32.xlu0 %v2100_v23, %s1963_s18  ;;  %585 = vrot.lane.b32.xlu1 %v2116_v29, %s1964_s20 }
  0x73   : > { %455 = vrot.lane.b32.xlu0 %v2112_v28, %s1956_s30  ;;  %583 = vrot.lane.b32.xlu1 %v2100_v23, %s1964_s20 }
  0x77   : > { %587 = vrot.lane.b32.xlu0 %v2112_v28, %s1964_s20  ;;  %483 = vrot.lane.b32.xlu1 %v2088_v15, %s1958_s10 }
  0x7b   : > { %598 = vrot.lane.b32.xlu0 %v2093_v19, %s2663_s22  ;;  %615 = vrot.lane.b32.xlu1 %v2088_v15, %s1966_s8 }
  0x7f   : > { %613 = vrot.lane.b32.xlu0 %v2108_v27, %s1966_s8  ;;  %611 = vrot.lane.b32.xlu1 %v2093_v19, %s1966_s8 }
  0x83   : > { %600 = vrot.lane.b32.xlu0 %v2100_v23, %s2663_s22  ;;  %619 = vrot.lane.b32.xlu1 %v2116_v29, %s1966_s8  ;;  %s1968_s22 = smov 109  }
  0x87   : > { %489 = vrot.lane.b32.xlu0 %v2112_v28, %s1958_s10  ;;  %617 = vrot.lane.b32.xlu1 %v2100_v23, %s1966_s8 }
  0x8b   : > { %621 = vrot.lane.b32.xlu0 %v2112_v28, %s1966_s8  ;;  %517 = vrot.lane.b32.xlu1 %v2088_v15, %s1960_s14 }
  0x8f   : > { %632 = vrot.lane.b32.xlu0 %v2093_v19, %s2665_s9  ;;  %523 = vrot.lane.b32.xlu1 %v2112_v28, %s1960_s14 }
  0x93   : > { %634 = vrot.lane.b32.xlu0 %v2100_v23, %s2665_s9  ;;  %649 = vrot.lane.b32.xlu1 %v2088_v15, %s1968_s22  ;;  %s1970_s9 = smov 49  }
  0x95   : > { %v404_v32 = vpop.permute.xlu1 %403 }
  0x97   : > { %647 = vrot.lane.b32.xlu0 %v2108_v27, %s1968_s22  ;;  %653 = vrot.lane.b32.xlu1 %v2116_v29, %s1968_s22 }
  0x99   : > { %v412_v33 = vpop.permute.xlu0 %411  ;;  %v418_v34 = vpop.permute.xlu1 %417 }
  0x9a   : > { %v435_v37 = vsel %vm423_vm1, %v404_v32, %v412_v33 }
  0x9b   : > { %645 = vrot.lane.b32.xlu0 %v2093_v19, %s1968_s22  ;;  %651 = vrot.lane.b32.xlu1 %v2100_v23, %s1968_s22 }
  0x9d   : > { %v2233_v35 = vpop.permute.xlu0 %413  ;;  %v406_v38 = vpop.permute.xlu1 %405 }
  0x9e   : > { %v424_v36 = vsel %vm423_vm1, %v412_v33, %v2233_v35  ;;  %v439_v40 = vsel %vm423_vm1, %v406_v38, %v418_v34 }
  0x9f   : > { %655 = vrot.lane.b32.xlu0 %v2112_v28, %s1968_s22  ;;  %740 = vmatprep.subr.bf16.mxu0 %v424_v36 }
  0xa0   : > { %741 = vmatpush1.bf16.msra.mxu0 %v435_v37  ;;  %668 = vrot.lane.b32.xlu1 %v2100_v23, %s1970_s9 }
  0xa1   : > { %v2242_v39 = vpop.permute.xlu0 %419  ;;  %v2252_v43 = vpop.permute.xlu1 %447 }
  0xa2   : > { %v426_v41 = vsel %vm423_vm1, %v418_v34, %v2242_v39 }
  0xa3   : > { %666 = vrot.lane.b32.xlu0 %v2093_v19, %s1970_s9  ;;  %742 = vmatprep.subr.bf16.mxu0 %v426_v41 }
  0xa4   : > { %743 = vmatpush1.bf16.msra.mxu0 %v439_v40  ;;  %690 = vperm.xlu1 %1885, %v680_v42  }
  0xa5   : > { %v446_v45 = vpop.permute.xlu0 %445  ;;  %v452_v48 = vpop.permute.xlu1 %451 }
  0xa6   : > { %v458_v46 = vsel %vm457_vm2, %v446_v45, %v2252_v43 }
  0xa7   : > { %744 = vmatprep.subr.bf16.mxu0 %v458_v46  ;;  %685 = vperm.xlu0 %1884, %v679_v44  }
  0xa8   : > { %695 = vperm.xlu1 %1885, %v681_v47  }
  0xa9   : > { %v442_v50 = vpop.permute.xlu0 %441  ;;  %v444_v52 = vpop.permute.xlu1 %443 }
  0xaa   : > { %v469_v51 = vsel %vm457_vm2, %v442_v50, %v446_v45  ;;  %v473_v54 = vsel %vm457_vm2, %v444_v52, %v452_v48 }
  0xab   : > { %745 = vmatpush1.bf16.msra.mxu0 %v469_v51  ;;  %700 = vperm.xlu0 %1884, %v682_v49  }
  0xad   : > { %v2260_v53 = vpop.permute.xlu0 %453  ;;  %v2265_v56 = vpop.permute.xlu1 %481 }
  0xae   : > { %v460_v55 = vsel %vm457_vm2, %v452_v48, %v2260_v53 }
  0xaf   : > { %746 = vmatprep.subr.bf16.mxu0 %v460_v55 }
  0xb0   : > { %747 = vmatpush1.bf16.msra.mxu0 %v473_v54 }
  0xb1   : > { %v480_v57 = vpop.permute.xlu0 %479  ;;  %v486_v59 = vpop.permute.xlu1 %485 }
  0xb2   : > { %v492_v58 = vsel %vm491_vm3, %v480_v57, %v2265_v56 }
  0xb3   : > { %748 = vmatprep.subr.bf16.mxu0 %v492_v58 }
  0xb5   : > { %v476_v60 = vpop.permute.xlu0 %475  ;;  %v478_v62 = vpop.permute.xlu1 %477 }
  0xb6   : > { %v503_v61 = vsel %vm491_vm3, %v476_v60, %v480_v57  ;;  %v507_v0 = vsel %vm491_vm3, %v478_v62, %v486_v59 }
  0xb7   : > { %749 = vmatpush1.bf16.msra.mxu0 %v503_v61 }
  0xb9   : > { %v2270_v63 = vpop.permute.xlu0 %487  ;;  %v2275_v2 = vpop.permute.xlu1 %515 }
  0xba   : > { %v494_v1 = vsel %vm491_vm3, %v486_v59, %v2270_v63 }
  0xbb   : > { %750 = vmatprep.subr.bf16.mxu0 %v494_v1 }
  0xbc   : > { %751 = vmatpush1.bf16.msra.mxu0 %v507_v0  ;;  %v1886_v0 = vld [vmem:[%s2051_s16] ss:$12 sps:$4 sm:$0xff]  }
  0xbd   : > { %v514_v3 = vpop.permute.xlu0 %513  ;;  %v520_v5 = vpop.permute.xlu1 %519 }
  0xbe   : > { %v526_v4 = vsel %vm525_vm4, %v514_v3, %v2275_v2 }
  0xbf   : > { %752 = vmatprep.subr.bf16.mxu0 %v526_v4 }
  0xc1   : > { %v510_v6 = vpop.permute.xlu0 %509  ;;  %v512_v8 = vpop.permute.xlu1 %511 }
  0xc2   : > { %v537_v7 = vsel %vm525_vm4, %v510_v6, %v514_v3  ;;  %v541_v10 = vsel %vm525_vm4, %v512_v8, %v520_v5  ;;  %v1889_v3 = vld [vmem:[%s2051_s16 + $0x1c] ss:$12 sps:$4 sm:$0xff]  }
  0xc3   : > { %753 = vmatpush1.bf16.msra.mxu0 %v537_v7 }
  0xc5   : > { %v2280_v9 = vpop.permute.xlu0 %521  ;;  %v546_v12 = vpop.permute.xlu1 %545 }
  0xc6   : > { %v528_v11 = vsel %vm525_vm4, %v520_v5, %v2280_v9 }
  0xc7   : > { %754 = vmatprep.subr.bf16.mxu0 %v528_v11 }
  0xc8   : > { %755 = vmatpush1.bf16.msra.mxu0 %v541_v10 }
  0xc9   : > { %v416_v13 = vpop.permute.xlu0 %415  ;;  %756 = vmatprep.subr.bf16.mxu0 %v2108_v27  ;;  %v544_v15 = vpop.permute.xlu1 %543 }
  0xca   : > { %v425_v14 = vsel %vm423_vm1, %v2233_v35, %v416_v13 }
  0xcb   : > { %1714 = vmatpush3.bf16.msra.mxu1 %v425_v14 }
  0xcc   : > { %757 = vmatpush1.bf16.msra.mxu0 %v2093_v19  ;;  %1715 = vmatprep.subr.bf16.mxu1 %v2112_v28  ;;  %v556_v19 = vsel %vm555_vm5, %v544_v15, %v546_v12 }
  0xcd   : > { %v548_v16 = vpop.permute.xlu0 %547  ;;  %758 = vmatprep.subr.bf16.mxu0 %v2116_v29  ;;  %v552_v17 = vpop.permute.xlu1 %551 }
  0xce   : > { %v557_v18 = vsel %vm555_vm5, %v546_v12, %v548_v16  ;;  %v1891_v12 = vld [vmem:[%s2051_s16 + $0x18] ss:$12 sps:$4 sm:$0xff]  }
  0xd0   : > { %759 = vmatpush1.bf16.msra.mxu0 %v2100_v23 }
  0xd1   : > { %760 = vmatprep.subr.bf16.mxu0 %v557_v18  ;;  %v422_v20 = vpop.permute.xlu0 %421  ;;  %v550_v22 = vpop.permute.xlu1 %549 }
  0xd2   : > { %v427_v21 = vsel %vm423_vm1, %v2242_v39, %v422_v20  ;;  %v558_v25 = vsel %vm555_vm5, %v550_v22, %v552_v17 }
  0xd3   : > { %1716 = vmatpush3.bf16.msra.mxu1 %v427_v21  ;;  %v1892_v21 = vld [vmem:[%s2051_s16 + $0x8] ss:$12 sps:$4 sm:$0xff]  }
  0xd4   : > { %761 = vmatpush1.bf16.msra.mxu0 %v556_v19 }
  0xd5   : > { %v554_v24 = vpop.permute.xlu0 %553  ;;  %v450_v23 = vpop.permute.xlu1 %449 }
  0xd6   : > { %v559_v26 = vsel %vm555_vm5, %v552_v17, %v554_v24  ;;  %v459_v28 = vsel %vm457_vm2, %v2252_v43, %v450_v23 }
  0xd7   : > { %762 = vmatprep.subr.bf16.mxu0 %v559_v26  ;;  %v1893_v26 = vld [vmem:[%s2051_s16 + $0x20] ss:$12 sps:$4 sm:$0xff]  }
  0xd8   : > { %763 = vmatpush1.bf16.msra.mxu0 %v558_v25 }
  0xd9   : > { %v565_v27 = vpop.permute.xlu0 %564  ;;  %v582_v30 = vpop.permute.xlu1 %581 }
  0xda   : > { %v571_v29 = vsel %vm568_vm6, %v548_v16, %v565_v27 }
  0xdb   : > { %1717 = vmatprep.subr.bf16.mxu1 %v571_v29 }
  0xdc   : > { %1718 = vmatpush3.bf16.msra.mxu1 %v459_v28  ;;  %v957_v28 = vlaneseq }
  0xdd   : > { %v580_v32 = vpop.permute.xlu0 %579  ;;  %v578_v34 = vpop.permute.xlu1 %577 }
  0xde   : > { %v591_v33 = vsel %vm589_vm7, %v580_v32, %v582_v30  ;;  %v590_v36 = vsel %vm589_vm7, %v578_v34, %v580_v32  ;;  %v958_v34 = vshrl.u32 %v957_v28, 7 }
  0xdf   : > { %764 = vmatprep.subr.bf16.mxu0 %v591_v33 }
  0xe0   : > { %765 = vmatpush1.bf16.msra.mxu0 %v590_v36 }
  0xe1   : > { %v567_v35 = vpop.permute.xlu0 %566  ;;  %v586_v38 = vpop.permute.xlu1 %585 }
  0xe2   : > { %v575_v37 = vsel %vm568_vm6, %v554_v24, %v567_v35 }
  0xe3   : > { %1719 = vmatprep.subr.bf16.mxu1 %v575_v37  ;;  %v959_v37 = vsub.s32 0, %v958_v34 }
  0xe5   : > { %v456_v39 = vpop.permute.xlu0 %455  ;;  %v584_v41 = vpop.permute.xlu1 %583 }
  0xe6   : > { %v461_v40 = vsel %vm457_vm2, %v2260_v53, %v456_v39  ;;  %v592_v43 = vsel %vm589_vm7, %v584_v41, %v586_v38  ;;  %v963_v41 = vsub.s32 1, %v958_v34 }
  0xe7   : > { %1720 = vmatpush3.bf16.msra.mxu1 %v461_v40  ;;  %v374_v40 = vld [vmem:[%s2656_s0] sm:$0x7] }
  0xe9   : > { %v588_v42 = vpop.permute.xlu0 %587  ;;  %v484_v45 = vpop.permute.xlu1 %483 }
  0xea   : > { %v593_v44 = vsel %vm589_vm7, %v586_v38, %v588_v42  ;;  %v493_v47 = vsel %vm491_vm3, %v2265_v56, %v484_v45 }
  0xeb   : > { %766 = vmatprep.subr.bf16.mxu0 %v593_v44 }
  0xec   : > { %767 = vmatpush1.bf16.msra.mxu0 %v592_v43 }
  0xed   : > { %v599_v46 = vpop.permute.xlu0 %598  ;;  %v616_v49 = vpop.permute.xlu1 %615 }
  0xee   : > { %v605_v48 = vsel %vm602_vm8, %v582_v30, %v599_v46 }
  0xef   : > { %1721 = vmatprep.subr.bf16.mxu1 %v605_v48  ;;  %v2344_v48 = vrot.slane %v374_v40, %v959_v37 }
  0xf0   : > { %1722 = vmatpush3.bf16.msra.mxu1 %v493_v47 }
  0xf1   : > { %v614_v50 = vpop.permute.xlu0 %613  ;;  %v612_v52 = vpop.permute.xlu1 %611 }
  0xf2   : > { %v625_v51 = vsel %vm623_vm9, %v614_v50, %v616_v49  ;;  %v624_v54 = vsel %vm623_vm9, %v612_v52, %v614_v50 }
  0xf3   : > { %768 = vmatprep.subr.bf16.mxu0 %v625_v51  ;;  %v2346_v51 = vrot.slane %v374_v40, %v963_v41 }
  0xf4   : > { %769 = vmatpush1.bf16.msra.mxu0 %v624_v54 }
  0xf5   : > { %v601_v53 = vpop.permute.xlu0 %600  ;;  %v620_v56 = vpop.permute.xlu1 %619 }
  0xf6   : > { %v609_v55 = vsel %vm602_vm8, %v588_v42, %v601_v53 }
  0xf7   : > { %1723 = vmatprep.subr.bf16.mxu1 %v609_v55 }
  0xf9   : > { %v490_v57 = vpop.permute.xlu0 %489  ;;  %v618_v59 = vpop.permute.xlu1 %617 }
  0xfa   : > { %v495_v58 = vsel %vm491_vm3, %v2270_v63, %v490_v57  ;;  %v626_v61 = vsel %vm623_vm9, %v618_v59, %v620_v56  ;;  %v967_v59 = vsub.s32 2, %v958_v34 }
  0xfb   : > { %1724 = vmatpush3.bf16.msra.mxu1 %v495_v58 }
  0xfd   : > { %v622_v60 = vpop.permute.xlu0 %621  ;;  %v518_v1 = vpop.permute.xlu1 %517 }
  0xfe   : > { %v627_v62 = vsel %vm623_vm9, %v620_v56, %v622_v60  ;;  %v527_v5 = vsel %vm525_vm4, %v2275_v2, %v518_v1 }
  0xff   : > { %770 = vmatprep.subr.bf16.mxu0 %v627_v62 }
 0x100   : > { %771 = vmatpush1.bf16.msra.mxu0 %v626_v61 }
 0x101   : > { %v633_v4 = vpop.permute.xlu0 %632  ;;  %v524_v6 = vpop.permute.xlu1 %523 }
 0x102   : > { %v639_v63 = vsel %vm636_vm10, %v616_v49, %v633_v4  ;;  %v529_v8 = vsel %vm525_vm4, %v2280_v9, %v524_v6 }
 0x103   : > { %1725 = vmatprep.subr.bf16.mxu1 %v639_v63  ;;  %773 = vmatmul.mubr.bf16.vlgmr.msra.gmra.mrb[0].mxu0 %v1886_v0 }
 0x104   : > { %1726 = vmatpush3.bf16.msra.mxu1 %v527_v5  ;;  %782 = vmatprep.mubr.bf16.mxu0 %v1889_v3 }
 0x105   : > { %v635_v7 = vpop.permute.xlu0 %634  ;;  %v650_v11 = vpop.permute.xlu1 %649 }
 0x106   : > { %v643_v10 = vsel %vm636_vm10, %v622_v60, %v635_v7  ;;  %v2352_v7 = vrot.slane %v374_v40, %v967_v59 }
 0x107   : > { %1727 = vmatprep.subr.bf16.mxu1 %v643_v10 }
 0x108   : > { %1728 = vmatpush3.bf16.msra.mxu1 %v529_v8 }
 0x109   : > { %v648_v2 = vpop.permute.xlu0 %647  ;;  %v654_v14 = vpop.permute.xlu1 %653 }
 0x10a   : > { %v659_v13 = vsel %vm657_vm11, %v648_v2, %v650_v11 }
 0x10b   : > { %793 = vmatprep.subr.bf16.mxu0 %v659_v13  ;;  %879 = vmatmul.mubr.bf16.vlgmr.msra.gmra.mrb[0].mxu1 %v1886_v0 }
 0x10c   : > { %783 = vmatmul.mubr.bf16.gmra.mrb[4].mxu0 %v1891_v12  ;;  %886 = vmatprep.mubr.bf16.mxu1 %v1889_v3 }
 0x10d   : > { %v646_v15 = vpop.permute.xlu0 %645  ;;  %825 = vmatprep.mubr.bf16.mxu0 %v1969_v31  ;;  %v652_v16 = vpop.permute.xlu1 %651 }
 0x10e   : > { %v658_v9 = vsel %vm657_vm11, %v646_v15, %v648_v2  ;;  %v660_v17 = vsel %vm657_vm11, %v652_v16, %v654_v14 }
 0x10f   : > { %794 = vmatpush1.bf16.msra.mxu0 %v658_v9 }
 0x111   : > { %v656_v18 = vpop.permute.xlu0 %655 }
 0x112   : > { %v661_v20 = vsel %vm657_vm11, %v654_v14, %v656_v18  ;;  %v669_v19 = vpop.permute.xlu1 %668 }
 0x113   : > { %795 = vmatprep.subr.bf16.mxu0 %v661_v20  ;;  %887 = vmatmul.mubr.bf16.gmra.mrb[4].mxu1 %v1891_v12  ;;  %v677_v25 = vsel %vm670_vm13, %v656_v18, %v669_v19 }
 0x114   : > { %796 = vmatpush1.bf16.msra.mxu0 %v660_v17  ;;  %1781 = vmatprep.mubr.msk.bf16.mxu1 %vm733_vm12, %v1892_v21 }
 0x115   : > { %v667_v22 = vpop.permute.xlu0 %666 }
 0x116   : > { %v673_v24 = vsel %vm670_vm13, %v650_v11, %v667_v22 }
 0x117   : > { %1695 = vmatmul.mubr.msk.bf16.vlgmr.msra.gmra.mrb[0].mxu0 %vm733_vm12, %v1892_v21  ;;  %1777 = vmatprep.subr.bf16.mxu1 %v673_v24 }
 0x118   : > { %1778 = vmatpush3.bf16.msra.mxu1 %v673_v24  ;;  %835 = vmatprep.mubr.bf16.mxu0 %v1969_v31 }
 0x119   : > { %1779 = vmatprep.subr.bf16.mxu1 %v677_v25 }
 0x11c   : > { %1780 = vmatpush3.bf16.msra.mxu1 %v677_v25 }
 0x11f   : > { %1696 = vmatmul.mubr.msk.bf16.gmra.mrb[4].mxu0 %vm733_vm12, %v1893_v26  ;;  %1782 = vmatmul.mubr.msk.bf16.vlgmr.msra.gmra.mrb[8].mxu1 %vm733_vm12, %v1893_v26 }
 0x123   : > { %v691_v42 = vpop.permute.xlu1 %690 }
 0x126   : > { %v686_v44 = vpop.permute.xlu0 %685 }
 0x127   : > { %v696_v56 = vpop.permute.xlu1 %695 }
 0x12a   : > { %v701_v0 = vpop.permute.xlu0 %700 }
 0x1de   : > { %v1729_v23 = vpop.f32.mrb[0].mxu1 }
 0x1df   : > { %v1730_v27 = vpop.f32.mrb[1].mxu1 }
 0x1e0   : > { %v1731_v29 = vadd.f32 %v1730_v27, %v1729_v23  ;;  %v1732_v30 = vpop.f32.mrb[2].mxu1 }
 0x1e1   : > { %v1733_v32 = vpop.f32.mrb[3].mxu1 }
 0x1e2   : > { %v1734_v33 = vadd.f32 %v1733_v32, %v1732_v30  ;;  %v881_v8 = vadd.f32 %v1731_v29, %v686_v44 }
 0x1e4   : > { %v884_v20 = vadd.f32 %v1734_v33, %v691_v42 }
 0x1e6   : > { %v1735_v35 = vpop.f32.mrb[4].mxu1 }
 0x1e7   : > { %v1736_v36 = vpop.f32.mrb[5].mxu1 }
 0x1e8   : > { %v1737_v38 = vadd.f32 %v1736_v36, %v1735_v35  ;;  %v1738_v39 = vpop.f32.mrb[6].mxu1 }
 0x1e9   : > { %v1739_v43 = vpop.f32.mrb[7].mxu1 }
 0x1ea   : > { %v1740_v45 = vadd.f32 %v1739_v43, %v1738_v39  ;;  %v827_v46 = vpop.f32.mrb[0].mxu0  ;;  %v889_v4 = vadd.f32 %v1737_v38, %v696_v56 }
 0x1eb   : > { %v1793_v47 = vadd.f32 %v827_v46, %v686_v44  ;;  %v829_v49 = vpop.f32.mrb[1].mxu0 }
 0x1ec   : > { %v1794_v50 = vadd.f32 %v829_v49, %v686_v44  ;;  %v831_v52 = vpop.f32.mrb[2].mxu0  ;;  %v892_v14 = vadd.f32 %v1740_v45, %v701_v0 }
 0x1ed   : > { %v944_v53 = vmax.f32 %v1793_v47, 0.0  ;;  %v1795_v54 = vadd.f32 %v831_v52, %v691_v42  ;;  %v833_v55 = vpop.f32.mrb[3].mxu0  ;;  %v1896_v47 = vld [vmem:[%s2056_s19 + $0x4] ss:$12 sps:$4 sm:$0xff]  }
 0x1ee   : > { %v945_v57 = vmax.f32 %v1794_v50, 0.0  ;;  %v1796_v58 = vadd.f32 %v833_v55, %v691_v42  ;;  %1352 = vmatprep.mubr.bf16.mxu1 %v1896_v47  ;;  %1458 = vmatprep.mubr.bf16.mxu0 %v1896_v47 }
 0x1ef   : > { %v972_v60 = vmul.f32 %v2344_v48, %v944_v53  ;;  %v947_v61 = vmax.f32 %v1795_v54, 0.0 }
 0x1f0   : > { %v973_v62 = vmul.f32 %v2346_v51, %v945_v57  ;;  %v948_v1 = vmax.f32 %v1796_v58, 0.0  ;;  %v1260_v57 = vld [vmem:[%s2061_s28] sm:$0xff] }
 0x1f1   : > { %v975_v3 = vmul.f32 %v2344_v48, %v947_v61  ;;  %v1262_v61 = vld [vmem:[%s2061_s28 + $0x10] sm:$0xff] }
 0x1f2   : > { %v976_v5 = vmul.f32 %v2346_v51, %v948_v1  ;;  %v837_v63 = vpop.f32.mrb[4].mxu0  ;;  %v1783_v6 = vpop.f32.mrb[8].mxu1 }
 0x1f3   : > { %v2354_v10 = vpack.c.bf16 %v975_v3, %v972_v60  ;;  %v1797_v11 = vadd.f32 %v837_v63, %v696_v56  ;;  %v938_v12 = vadd.f32 %v1783_v6, %v889_v4  ;;  %v839_v2 = vpop.f32.mrb[5].mxu0  ;;  %v929_v13 = vpop.f32.mrb[9].mxu1  ;;  %v1263_v60 = vld [vmem:[%s2061_s28 + $0x18] sm:$0xff] }
 0x1f4   : > { %v2356_v15 = vpack.c.bf16 %v976_v5, %v973_v62  ;;  %v1798_v9 = vadd.f32 %v839_v2, %v696_v56  ;;  %v930_v16 = vadd.f32 %v929_v13, %v881_v8  ;;  %v841_v17 = vpop.f32.mrb[6].mxu0  ;;  %v1784_v18 = vpop.f32.mrb[10].mxu1  ;;  %v1261_v56 = vld [vmem:[%s2061_s28 + $0x8] sm:$0xff] }
 0x1f5   : > { %v950_v21 = vmax.f32 %v1797_v11, 0.0  ;;  %v952_v19 = vmax.f32 %v938_v12, 0.0  ;;  %v1799_v22 = vadd.f32 %v841_v17, %v701_v0  ;;  %v941_v24 = vadd.f32 %v1784_v18, %v892_v14  ;;  %v843_v25 = vpop.f32.mrb[7].mxu0  ;;  %v932_v26 = vpop.f32.mrb[11].mxu1 }
 0x1f6   : > { %v951_v23 = vmax.f32 %v1798_v9, 0.0  ;;  %v946_v27 = vmax.f32 %v930_v16, 0.0  ;;  %v1800_v28 = vadd.f32 %v843_v25, %v701_v0  ;;  %v933_v29 = vadd.f32 %v932_v26, %v884_v20 }
 0x1f7   : > { %v953_v30 = vmax.f32 %v1799_v22, 0.0  ;;  %v955_v32 = vmax.f32 %v941_v24, 0.0  ;;  %v978_v36 = vmul.f32 %v2344_v48, %v950_v21  ;;  %v980_v37 = vmul.f32 %v2352_v7, %v952_v19 }
 0x1f8   : > { %v954_v34 = vmax.f32 %v1800_v28, 0.0  ;;  %v949_v35 = vmax.f32 %v933_v29, 0.0  ;;  %v979_v39 = vmul.f32 %v2346_v51, %v951_v23  ;;  %v974_v40 = vmul.f32 %v2352_v7, %v946_v27 }
 0x1f9   : > { %v981_v33 = vmul.f32 %v2344_v48, %v953_v30  ;;  %v983_v38 = vmul.f32 %v2352_v7, %v955_v32 }
 0x1fa   : > { %v982_v41 = vmul.f32 %v2346_v51, %v954_v34  ;;  %v977_v42 = vmul.f32 %v2352_v7, %v949_v35 }
 0x1fb   : > { %v2366_v43 = vpack.c.bf16 %v981_v33, %v978_v36  ;;  %v2368_v44 = vpack.c.bf16 %v983_v38, %v980_v37 }
 0x1fc   : > { %v2370_v45 = vpack.c.bf16 %v982_v41, %v979_v39  ;;  %v994_v46 = vpack.c.bf16 %v977_v42, %v974_v40 }
 0x1fd   : > { %1018 = vrot.lane.b32.xlu1 %v2368_v44, %s1955_s29  ;;  %1002 = vrot.lane.b32.xlu0 %v2368_v44, %s1954_s21 }
 0x1fe   : > { %1745 = vmatprep.subr.bf16.mxu0 %v994_v46 }
 0x201   : > { %1038 = vrot.lane.b32.xlu0 %v2368_v44, %s1957_s7  ;;  %1000 = vrot.lane.b32.xlu1 %v994_v46, %s1954_s21  ;;  %s2667_s21 = smov 51  }
 0x205   : > { %1070 = vrot.lane.b32.xlu0 %v2368_v44, %s1959_s12  ;;  %1036 = vrot.lane.b32.xlu1 %v994_v46, %s1957_s7 }
 0x209   : > { %1102 = vrot.lane.b32.xlu0 %v2368_v44, %s1961_s15  ;;  %1068 = vrot.lane.b32.xlu1 %v994_v46, %s1959_s12 }
 0x20d   : > { %1142 = vrot.lane.b32.xlu0 %v2368_v44, %s1962_s17  ;;  %1100 = vrot.lane.b32.xlu1 %v994_v46, %s1961_s15 }
 0x211   : > { %1136 = vrot.lane.b32.xlu0 %v994_v46, %s1962_s17  ;;  %1012 = vrot.lane.b32.xlu1 %v994_v46, %s1955_s29 }
 0x215   : > { %1132 = vrot.lane.b32.xlu0 %v2354_v10, %s1962_s17  ;;  %1008 = vrot.lane.b32.xlu1 %v2354_v10, %s1955_s29 }
 0x219   : > { %1010 = vrot.lane.b32.xlu0 %v2356_v15, %s1955_s29  ;;  %1040 = vrot.lane.b32.xlu1 %v2354_v10, %s1956_s30 }
 0x21d   : > { %1042 = vrot.lane.b32.xlu0 %v2356_v15, %s1956_s30  ;;  %1072 = vrot.lane.b32.xlu1 %v2354_v10, %s1958_s10 }
 0x221   : > { %1074 = vrot.lane.b32.xlu0 %v2356_v15, %s1958_s10  ;;  %1104 = vrot.lane.b32.xlu1 %v2354_v10, %s1960_s14 }
 0x225   : > { %1106 = vrot.lane.b32.xlu0 %v2356_v15, %s1960_s14  ;;  %1152 = vrot.lane.b32.xlu1 %v2354_v10, %s1963_s18 }
 0x229   : > { %1014 = vrot.lane.b32.xlu0 %v2366_v43, %s1955_s29  ;;  %1134 = vrot.lane.b32.xlu1 %v2356_v15, %s1962_s17 }
 0x22d   : > { %1166 = vrot.lane.b32.xlu0 %v2356_v15, %s1964_s20  ;;  %1016 = vrot.lane.b32.xlu1 %v2370_v45, %s1955_s29  ;;  %s2668_s29 = smov 50  }
 0x231   : > { %1046 = vrot.lane.b32.xlu0 %v2366_v43, %s1956_s30  ;;  %1168 = vrot.lane.b32.xlu1 %v994_v46, %s1964_s20 }
 0x235   : > { %1078 = vrot.lane.b32.xlu0 %v2366_v43, %s1958_s10  ;;  %1048 = vrot.lane.b32.xlu1 %v2370_v45, %s1956_s30 }
 0x239   : > { %1110 = vrot.lane.b32.xlu0 %v2366_v43, %s1960_s14  ;;  %1164 = vrot.lane.b32.xlu1 %v2354_v10, %s1964_s20 }
 0x23d   : > { %1138 = vrot.lane.b32.xlu0 %v2366_v43, %s1962_s17  ;;  %1080 = vrot.lane.b32.xlu1 %v2370_v45, %s1958_s10 }
 0x241   : > { %1044 = vrot.lane.b32.xlu0 %v994_v46, %s1956_s30  ;;  %1050 = vrot.lane.b32.xlu1 %v2368_v44, %s1956_s30 }
 0x245   : > { %1154 = vrot.lane.b32.xlu0 %v2366_v43, %s1963_s18  ;;  %1112 = vrot.lane.b32.xlu1 %v2370_v45, %s1960_s14 }
 0x249   : > { %1174 = vrot.lane.b32.xlu0 %v2368_v44, %s1964_s20  ;;  %1184 = vrot.lane.b32.xlu1 %v2354_v10, %s2667_s21 }
 0x24d   : > { %1170 = vrot.lane.b32.xlu0 %v2366_v43, %s1964_s20  ;;  %1200 = vrot.lane.b32.xlu1 %v994_v46, %s1966_s8 }
 0x251   : > { %1198 = vrot.lane.b32.xlu0 %v2356_v15, %s1966_s8  ;;  %1196 = vrot.lane.b32.xlu1 %v2354_v10, %s1966_s8 }
 0x255   : > { %1076 = vrot.lane.b32.xlu0 %v994_v46, %s1958_s10  ;;  %1140 = vrot.lane.b32.xlu1 %v2370_v45, %s1962_s17 }
 0x259   : > { %1186 = vrot.lane.b32.xlu0 %v2366_v43, %s2667_s21  ;;  %1082 = vrot.lane.b32.xlu1 %v2368_v44, %s1958_s10 }
 0x25d   : > { %1206 = vrot.lane.b32.xlu0 %v2368_v44, %s1966_s8  ;;  %1172 = vrot.lane.b32.xlu1 %v2370_v45, %s1964_s20 }
 0x261   : > { %1202 = vrot.lane.b32.xlu0 %v2366_v43, %s1966_s8  ;;  %1216 = vrot.lane.b32.xlu1 %v2354_v10, %s2668_s29 }
 0x265   : > { %1108 = vrot.lane.b32.xlu0 %v994_v46, %s1960_s14  ;;  %1204 = vrot.lane.b32.xlu1 %v2370_v45, %s1966_s8 }
 0x269   : > { %1114 = vrot.lane.b32.xlu0 %v2368_v44, %s1960_s14  ;;  %1218 = vrot.lane.b32.xlu1 %v2366_v43, %s2668_s29 }
 0x26d   : > { %1232 = vrot.lane.b32.xlu0 %v994_v46, %s1968_s22  ;;  %1230 = vrot.lane.b32.xlu1 %v2356_v15, %s1968_s22 }
 0x26f   : > { %v1019_v49 = vpop.permute.xlu1 %1018  ;;  %v1003_v50 = vpop.permute.xlu0 %1002 }
 0x271   : > { %1236 = vrot.lane.b32.xlu0 %v2370_v45, %s1968_s22  ;;  %1228 = vrot.lane.b32.xlu1 %v2354_v10, %s1968_s22 }
 0x273   : > { %v1039_v52 = vpop.permute.xlu0 %1038  ;;  %v1001_v53 = vpop.permute.xlu1 %1000 }
 0x275   : > { %1234 = vrot.lane.b32.xlu0 %v2366_v43, %s1968_s22  ;;  %1238 = vrot.lane.b32.xlu1 %v2368_v44, %s1968_s22 }
 0x277   : > { %v2485_v54 = vpop.permute.xlu0 %1070  ;;  %v1037_v55 = vpop.permute.xlu1 %1036 }
 0x279   : > { %1250 = vrot.lane.b32.xlu0 %v2366_v43, %s1970_s9  ;;  %1248 = vrot.lane.b32.xlu1 %v2354_v10, %s1970_s9 }
 0x27b   : > { %v2493_v58 = vpop.permute.xlu0 %1102  ;;  %v1069_v59 = vpop.permute.xlu1 %1068 }
 0x27d   : > { %1271 = vperm.xlu0 %1884, %v1261_v56   ;;  %1266 = vperm.xlu1 %1885, %v1260_v57  }
 0x27f   : > { %v2497_v62 = vpop.permute.xlu0 %1142  ;;  %v2499_v0 = vpop.permute.xlu1 %1100 }
 0x281   : > { %1281 = vperm.xlu0 %1884, %v1263_v60   ;;  %1276 = vperm.xlu1 %1885, %v1262_v61  }
 0x283   : > { %v2501_v1 = vpop.permute.xlu0 %1136  ;;  %v1013_v3 = vpop.permute.xlu1 %1012 }
 0x287   : > { %v2503_v4 = vpop.permute.xlu0 %1132  ;;  %v1009_v5 = vpop.permute.xlu1 %1008 }
 0x288   : > { %v1030_v12 = vsel %vm423_vm1, %v1001_v53, %v1009_v5 }
 0x28b   : > { %v1011_v63 = vpop.permute.xlu0 %1010  ;;  %v1041_v6 = vpop.permute.xlu1 %1040 }
 0x28c   : > { %v1021_v8 = vsel %vm423_vm1, %v1011_v63, %v1013_v3  ;;  %v1020_v11 = vsel %vm423_vm1, %v1009_v5, %v1011_v63  ;;  %v1062_v29 = vsel %vm457_vm2, %v1037_v55, %v1041_v6 }
 0x28d   : > { %1320 = vmatprep.subr.bf16.mxu1 %v1020_v11  ;;  %1746 = vmatpush3.bf16.msra.mxu0 %v1021_v8 }
 0x28e   : > { %1321 = vmatpush1.bf16.msra.mxu1 %v1030_v12  ;;  %1747 = vmatprep.subr.bf16.mxu0 %v2368_v44 }
 0x28f   : > { %v1043_v2 = vpop.permute.xlu0 %1042  ;;  %v1073_v13 = vpop.permute.xlu1 %1072 }
 0x290   : > { %v1052_v23 = vsel %vm457_vm2, %v1041_v6, %v1043_v2  ;;  %v1094_v38 = vsel %vm491_vm3, %v1069_v59, %v1073_v13 }
 0x293   : > { %v2509_v14 = vpop.permute.xlu0 %1074  ;;  %v1105_v9 = vpop.permute.xlu1 %1104 }
 0x294   : > { %v1084_v36 = vsel %vm491_vm3, %v1073_v13, %v2509_v14 }
 0x297   : > { %v2511_v16 = vpop.permute.xlu0 %1106  ;;  %v1153_v17 = vpop.permute.xlu1 %1152 }
 0x298   : > { %v1158_v26 = vsel %vm568_vm6, %v2501_v1, %v1153_v17  ;;  %v1116_v44 = vsel %vm525_vm4, %v1105_v9, %v2511_v16 }
 0x29b   : > { %v1015_v18 = vpop.permute.xlu0 %1014  ;;  %v2513_v20 = vpop.permute.xlu1 %1134 }
 0x29c   : > { %v1034_v25 = vsel %vm423_vm1, %v1003_v50, %v1015_v18  ;;  %v1126_v50 = vsel %vm525_vm4, %v2499_v0, %v1105_v9  ;;  %v1145_v3 = vsel %vm555_vm5, %v2513_v20, %v2501_v1  ;;  %v1144_v63 = vsel %vm555_vm5, %v2503_v4, %v2513_v20 }
 0x29f   : > { %v2515_v21 = vpop.permute.xlu0 %1166  ;;  %v1017_v19 = vpop.permute.xlu1 %1016 }
 0x2a0   : > { %v1023_v22 = vsel %vm423_vm1, %v1017_v19, %v1019_v49  ;;  %v1022_v24 = vsel %vm423_vm1, %v1015_v18, %v1017_v19 }
 0x2a1   : > { %1322 = vmatprep.subr.bf16.mxu1 %v1022_v24  ;;  %1748 = vmatpush3.bf16.msra.mxu0 %v1023_v22 }
 0x2a2   : > { %1323 = vmatpush1.bf16.msra.mxu1 %v1034_v25  ;;  %1749 = vmatprep.subr.bf16.mxu0 %v1158_v26 }
 0x2a3   : > { %v1047_v27 = vpop.permute.xlu0 %1046  ;;  %1324 = vmatprep.subr.bf16.mxu1 %v1052_v23  ;;  %v2523_v28 = vpop.permute.xlu1 %1168 }
 0x2a4   : > { %v1066_v35 = vsel %vm457_vm2, %v1039_v52, %v1047_v27  ;;  %v1177_v1 = vsel %vm589_vm7, %v2515_v21, %v2523_v28 }
 0x2a6   : > { %1325 = vmatpush1.bf16.msra.mxu1 %v1062_v29  ;;  %v1897_v29 = vld [vmem:[%s2056_s19 + $0x1c] ss:$12 sps:$4 sm:$0xff]  }
 0x2a7   : > { %v1079_v30 = vpop.permute.xlu0 %1078  ;;  %v1049_v32 = vpop.permute.xlu1 %1048 }
 0x2a8   : > { %v1054_v34 = vsel %vm457_vm2, %v1047_v27, %v1049_v32  ;;  %v1098_v42 = vsel %vm491_vm3, %v2485_v54, %v1079_v30 }
 0x2a9   : > { %1326 = vmatprep.subr.bf16.mxu1 %v1054_v34 }
 0x2aa   : > { %1327 = vmatpush1.bf16.msra.mxu1 %v1066_v35 }
 0x2ab   : > { %v1111_v37 = vpop.permute.xlu0 %1110  ;;  %1328 = vmatprep.subr.bf16.mxu1 %v1084_v36  ;;  %v1165_v33 = vpop.permute.xlu1 %1164 }
 0x2ac   : > { %v1130_v56 = vsel %vm525_vm4, %v2493_v58, %v1111_v37  ;;  %v1176_v13 = vsel %vm589_vm7, %v1165_v33, %v2515_v21  ;;  %v1899_v33 = vld [vmem:[%s2056_s19 + $0x18] ss:$12 sps:$4 sm:$0xff]  }
 0x2ae   : > { %1329 = vmatpush1.bf16.msra.mxu1 %v1094_v38 }
 0x2af   : > { %v1139_v39 = vpop.permute.xlu0 %1138  ;;  %v1081_v40 = vpop.permute.xlu1 %1080 }
 0x2b0   : > { %v1086_v41 = vsel %vm491_vm3, %v1079_v30, %v1081_v40 }
 0x2b1   : > { %1330 = vmatprep.subr.bf16.mxu1 %v1086_v41 }
 0x2b2   : > { %1331 = vmatpush1.bf16.msra.mxu1 %v1098_v42 }
 0x2b3   : > { %v1045_v46 = vpop.permute.xlu0 %1044  ;;  %1332 = vmatprep.subr.bf16.mxu1 %v1116_v44  ;;  %v1051_v47 = vpop.permute.xlu1 %1050 }
 0x2b4   : > { %v1053_v49 = vsel %vm457_vm2, %v1043_v2, %v1045_v46  ;;  %v1055_v57 = vsel %vm457_vm2, %v1049_v32, %v1051_v47  ;;  %v1900_v47 = vld [vmem:[%s2056_s19 + $0x8] ss:$12 sps:$4 sm:$0xff]  }
 0x2b5   : > { %1750 = vmatpush3.bf16.msra.mxu0 %v1053_v49 }
 0x2b6   : > { %1333 = vmatpush1.bf16.msra.mxu1 %v1126_v50 }
 0x2b7   : > { %v1155_v52 = vpop.permute.xlu0 %1154  ;;  %v2539_v53 = vpop.permute.xlu1 %1112 }
 0x2b8   : > { %v1118_v54 = vsel %vm525_vm4, %v1111_v37, %v2539_v53  ;;  %v1162_v55 = vsel %vm568_vm6, %v2497_v62, %v1155_v52 }
 0x2b9   : > { %1334 = vmatprep.subr.bf16.mxu1 %v1118_v54  ;;  %1751 = vmatprep.subr.bf16.mxu0 %v1162_v55  ;;  %v1901_v54 = vld [vmem:[%s2056_s19 + $0x20] ss:$12 sps:$4 sm:$0xff]  }
 0x2ba   : > { %1335 = vmatpush1.bf16.msra.mxu1 %v1130_v56  ;;  %1752 = vmatpush3.bf16.msra.mxu0 %v1055_v57 }
 0x2bb   : > { %v1175_v59 = vpop.permute.xlu0 %1174  ;;  %1336 = vmatprep.subr.bf16.mxu1 %v2356_v15  ;;  %v1185_v60 = vpop.permute.xlu1 %1184 }
 0x2bc   : > { %v1190_v61 = vsel %vm602_vm8, %v2523_v28, %v1185_v60  ;;  %v1894_v28 = vld [vmem:[%s2056_s19] ss:$12 sps:$4 sm:$0xff]  }
 0x2bd   : > { %1753 = vmatprep.subr.bf16.mxu0 %v1190_v61 }
 0x2be   : > { %1337 = vmatpush1.bf16.msra.mxu1 %v2354_v10 }
 0x2bf   : > { %v1171_v0 = vpop.permute.xlu0 %1170  ;;  %1338 = vmatprep.subr.bf16.mxu1 %v2370_v45  ;;  %v1201_v58 = vpop.permute.xlu1 %1200 }
 0x2c2   : > { %1339 = vmatpush1.bf16.msra.mxu1 %v2366_v43 }
 0x2c3   : > { %v1199_v5 = vpop.permute.xlu0 %1198  ;;  %1340 = vmatprep.subr.bf16.mxu1 %v1145_v3  ;;  %v1197_v15 = vpop.permute.xlu1 %1196 }
 0x2c4   : > { %v1209_v18 = vsel %vm623_vm9, %v1199_v5, %v1201_v58  ;;  %v1208_v22 = vsel %vm623_vm9, %v1197_v15, %v1199_v5 }
 0x2c6   : > { %1341 = vmatpush1.bf16.msra.mxu1 %v1144_v63 }
 0x2c7   : > { %v1077_v6 = vpop.permute.xlu0 %1076  ;;  %v1141_v10 = vpop.permute.xlu1 %1140 }
 0x2c8   : > { %v1085_v45 = vsel %vm491_vm3, %v2509_v14, %v1077_v6  ;;  %v1146_v8 = vsel %vm555_vm5, %v1139_v39, %v1141_v10  ;;  %v1147_v43 = vsel %vm555_vm5, %v1141_v10, %v2497_v62 }
 0x2c9   : > { %1342 = vmatprep.subr.bf16.mxu1 %v1147_v43  ;;  %1754 = vmatpush3.bf16.msra.mxu0 %v1085_v45 }
 0x2ca   : > { %1343 = vmatpush1.bf16.msra.mxu1 %v1146_v8 }
 0x2cb   : > { %v1187_v11 = vpop.permute.xlu0 %1186  ;;  %1344 = vmatprep.subr.bf16.mxu1 %v1177_v1  ;;  %v1083_v4 = vpop.permute.xlu1 %1082 }
 0x2cc   : > { %v1087_v12 = vsel %vm491_vm3, %v1081_v40, %v1083_v4  ;;  %v1194_v2 = vsel %vm602_vm8, %v1175_v59, %v1187_v11  ;;  %v1902_v11 = vld [vmem:[%s2066_s11] sm:$0xff] }
 0x2cd   : > { %1755 = vmatprep.subr.bf16.mxu0 %v1194_v2 }
 0x2ce   : > { %1345 = vmatpush1.bf16.msra.mxu1 %v1176_v13  ;;  %1756 = vmatpush3.bf16.msra.mxu0 %v1087_v12  ;;  %v1903_v13 = vld [vmem:[%s2066_s11 + $0x8] sm:$0xff] }
 0x2cf   : > { %v1207_v62 = vpop.permute.xlu0 %1206  ;;  %v1173_v14 = vpop.permute.xlu1 %1172 }
 0x2d0   : > { %v1178_v9 = vsel %vm589_vm7, %v1171_v0, %v1173_v14  ;;  %v1179_v17 = vsel %vm589_vm7, %v1173_v14, %v1175_v59 }
 0x2d1   : > { %1346 = vmatprep.subr.bf16.mxu1 %v1179_v17  ;;  %v1904_v17 = vld [vmem:[%s2066_s11 + $0x18] sm:$0xff] }
 0x2d2   : > { %1347 = vmatpush1.bf16.msra.mxu1 %v1178_v9 }
 0x2d3   : > { %v1203_v20 = vpop.permute.xlu0 %1202  ;;  %1348 = vmatprep.subr.bf16.mxu1 %v1209_v18  ;;  %v1217_v19 = vpop.permute.xlu1 %1216 }
 0x2d4   : > { %v1222_v21 = vsel %vm636_vm10, %v1201_v58, %v1217_v19 }
 0x2d5   : > { %1757 = vmatprep.subr.bf16.mxu0 %v1222_v21  ;;  %v1905_v21 = vld [vmem:[%s2066_s11 + $0x20] sm:$0xff] }
 0x2d6   : > { %1349 = vmatpush1.bf16.msra.mxu1 %v1208_v22 }
 0x2d7   : > { %v1109_v24 = vpop.permute.xlu0 %1108  ;;  %v1205_v25 = vpop.permute.xlu1 %1204 }
 0x2d8   : > { %v1117_v26 = vsel %vm525_vm4, %v2511_v16, %v1109_v24  ;;  %v1210_v23 = vsel %vm623_vm9, %v1203_v20, %v1205_v25  ;;  %v1211_v27 = vsel %vm623_vm9, %v1205_v25, %v1207_v62 }
 0x2d9   : > { %1350 = vmatprep.subr.bf16.mxu1 %v1211_v27  ;;  %1758 = vmatpush3.bf16.msra.mxu0 %v1117_v26 }
 0x2da   : > { %1351 = vmatpush1.bf16.msra.mxu1 %v1210_v23 }
 0x2db   : > { %v1115_v30 = vpop.permute.xlu0 %1114  ;;  %v1219_v32 = vpop.permute.xlu1 %1218 }
 0x2dc   : > { %v1119_v34 = vsel %vm525_vm4, %v2539_v53, %v1115_v30  ;;  %v1226_v35 = vsel %vm636_vm10, %v1207_v62, %v1219_v32 }
 0x2dd   : > { %1353 = vmatmul.mubr.bf16.vlgmr.msra.gmra.mrb[12].mxu1 %v1894_v28  ;;  %1759 = vmatprep.subr.bf16.mxu0 %v1226_v35 }
 0x2de   : > { %1760 = vmatpush3.bf16.msra.mxu0 %v1119_v34  ;;  %1362 = vmatprep.mubr.bf16.mxu1 %v1897_v29 }
 0x2df   : > { %v1233_v16 = vpop.permute.xlu0 %1232  ;;  %v1231_v36 = vpop.permute.xlu1 %1230 }
 0x2e0   : > { %v1241_v37 = vsel %vm657_vm11, %v1231_v36, %v1233_v16 }
 0x2e1   : > { %1373 = vmatprep.subr.bf16.mxu1 %v1241_v37  ;;  %1459 = vmatmul.mubr.bf16.vlgmr.msra.gmra.mrb[8].mxu0 %v1894_v28 }
 0x2e2   : > { %1466 = vmatprep.mubr.bf16.mxu0 %v1897_v29 }
 0x2e3   : > { %v1237_v38 = vpop.permute.xlu0 %1236  ;;  %v1229_v39 = vpop.permute.xlu1 %1228 }
 0x2e4   : > { %v1240_v40 = vsel %vm657_vm11, %v1229_v39, %v1231_v36 }
 0x2e5   : > { %1363 = vmatmul.mubr.bf16.gmra.mrb[16].mxu1 %v1899_v33 }
 0x2e6   : > { %1374 = vmatpush1.bf16.msra.mxu1 %v1240_v40  ;;  %1405 = vmatprep.mubr.bf16.mxu1 %v1969_v31  ;;  %v1906_v40 = vld [vmem:[%s2066_s11 + $0x30] sm:$0xff] }
 0x2e7   : > { %v1235_v41 = vpop.permute.xlu0 %1234  ;;  %v1239_v42 = vpop.permute.xlu1 %1238 }
 0x2e8   : > { %v1242_v44 = vsel %vm657_vm11, %v1235_v41, %v1237_v38  ;;  %v1243_v46 = vsel %vm657_vm11, %v1237_v38, %v1239_v42 }
 0x2e9   : > { %1375 = vmatprep.subr.bf16.mxu1 %v1243_v46  ;;  %1467 = vmatmul.mubr.bf16.gmra.mrb[12].mxu0 %v1899_v33 }
 0x2ea   : > { %1376 = vmatpush1.bf16.msra.mxu1 %v1242_v44  ;;  %1789 = vmatprep.mubr.msk.bf16.mxu0 %vm733_vm12, %v1900_v47 }
 0x2eb   : > { %v1251_v49 = vpop.permute.xlu0 %1250  ;;  %v1249_v50 = vpop.permute.xlu1 %1248 }
 0x2ec   : > { %v1254_v52 = vsel %vm670_vm13, %v1233_v16, %v1249_v50  ;;  %v1258_v53 = vsel %vm670_vm13, %v1239_v42, %v1251_v49  ;;  %v1907_v42 = vld [vmem:[%s2066_s11 + $0x40] sm:$0xff] }
 0x2ed   : > { %1705 = vmatmul.mubr.msk.bf16.vlgmr.msra.gmra.mrb[12].mxu1 %vm733_vm12, %v1900_v47  ;;  %1785 = vmatprep.subr.bf16.mxu0 %v1254_v52 }
 0x2ee   : > { %1786 = vmatpush3.bf16.msra.mxu0 %v1254_v52  ;;  %1415 = vmatprep.mubr.bf16.mxu1 %v1969_v31  ;;  %v1908_v52 = vld [vmem:[%s2066_s11 + $0x38] sm:$0xff] }
 0x2ef   : > { %1787 = vmatprep.subr.bf16.mxu0 %v1258_v53 }
 0x2f2   : > { %1788 = vmatpush3.bf16.msra.mxu0 %v1258_v53 }
 0x2f5   : > { %1706 = vmatmul.mubr.msk.bf16.gmra.mrb[16].mxu1 %vm733_vm12, %v1901_v54  ;;  %1790 = vmatmul.mubr.msk.bf16.vlgmr.msra.gmra.mrb[16].mxu0 %vm733_vm12, %v1901_v54  ;;  %v1909_v54 = vld [vmem:[%s2066_s11 + $0x10] sm:$0xff] }
 0x2fc   : > { %v1267_v15 = vpop.permute.xlu1 %1266  ;;  %v1272_v10 = vpop.permute.xlu0 %1271 }
 0x300   : > { %v1277_v20 = vpop.permute.xlu1 %1276  ;;  %v1282_v24 = vpop.permute.xlu0 %1281 }
 0x3b4   : > { %v1761_v55 = vpop.f32.mrb[8].mxu0 }
 0x3b5   : > { %v1762_v56 = vpop.f32.mrb[9].mxu0 }
 0x3b6   : > { %v1763_v57 = vadd.f32 %v1762_v56, %v1761_v55  ;;  %v1764_v59 = vpop.f32.mrb[10].mxu0 }
 0x3b7   : > { %v1765_v60 = vpop.f32.mrb[11].mxu0 }
 0x3b8   : > { %v1766_v61 = vadd.f32 %v1765_v60, %v1764_v59  ;;  %v1461_v29 = vadd.f32 %v1763_v57, %v1267_v15 }
 0x3ba   : > { %v1464_v39 = vadd.f32 %v1766_v61, %v1272_v10  ;;  %v1910_v61 = vld [vmem:[%s2066_s11 + $0x48] sm:$0xff] }
 0x3bc   : > { %v1767_v0 = vpop.f32.mrb[12].mxu0 }
 0x3bd   : > { %v1768_v58 = vpop.f32.mrb[13].mxu0 }
 0x3be   : > { %v1769_v3 = vadd.f32 %v1768_v58, %v1767_v0  ;;  %v1770_v5 = vpop.f32.mrb[14].mxu0  ;;  %v1911_v58 = vld [vmem:[%s2066_s11 + $0x58] sm:$0xff] }
 0x3bf   : > { %v1771_v31 = vpop.f32.mrb[15].mxu0 }
 0x3c0   : > { %v1772_v63 = vadd.f32 %v1771_v31, %v1770_v5  ;;  %v1407_v6 = vpop.f32.mrb[12].mxu1  ;;  %v1469_v26 = vadd.f32 %v1769_v3, %v1277_v20 }
 0x3c1   : > { %v1801_v45 = vadd.f32 %v1407_v6, %v1267_v15  ;;  %v1409_v8 = vpop.f32.mrb[13].mxu1  ;;  %v1913_v6 = vld [vmem:[%s2066_s11 + $0x28] sm:$0xff] }
 0x3c2   : > { %v1802_v43 = vadd.f32 %v1409_v8, %v1267_v15  ;;  %v1411_v1 = vpop.f32.mrb[14].mxu1  ;;  %v1472_v16 = vadd.f32 %v1772_v63, %v1282_v24  ;;  %v1912_v15 = vld [vmem:[%s2066_s11 + $0x50] sm:$0xff] }
 0x3c3   : > { %v1524_v4 = vadd.f32 %v1902_v11, %v1801_v45  ;;  %v1803_v12 = vadd.f32 %v1411_v1, %v1272_v10  ;;  %v1413_v2 = vpop.f32.mrb[15].mxu1 }
 0x3c4   : > { %v1525_v62 = vadd.f32 %v1903_v13, %v1802_v43  ;;  %v1804_v14 = vadd.f32 %v1413_v2, %v1272_v10 }
 0x3c5   : > { %v1536_v9 = vmul.f32 %v1524_v4, %v2344_v48  ;;  %v1527_v18 = vadd.f32 %v1904_v17, %v1803_v12 }
 0x3c6   : > { %v1537_v19 = vmul.f32 %v1525_v62, %v2346_v51  ;;  %v1528_v22 = vadd.f32 %v1905_v21, %v1804_v14 }
 0x3c7   : > { %1548 = vst [vmem:[%s2066_s11] sm:$0xff] %v1536_v9  ;;  %v1539_v25 = vmul.f32 %v1527_v18, %v2344_v48 }
 0x3c8   : > { %1549 = vst [vmem:[%s2066_s11 + $0x8] sm:$0xff] %v1537_v19  ;;  %v1540_v23 = vmul.f32 %v1528_v22, %v2346_v51  ;;  %v1417_v27 = vpop.f32.mrb[16].mxu1  ;;  %v1791_v28 = vpop.f32.mrb[16].mxu0 }
 0x3c9   : > { %1552 = vst [vmem:[%s2066_s11 + $0x18] sm:$0xff] %v1539_v25  ;;  %v1805_v30 = vadd.f32 %v1417_v27, %v1277_v20  ;;  %v1518_v32 = vadd.f32 %v1791_v28, %v1469_v26  ;;  %v1419_v34 = vpop.f32.mrb[17].mxu1  ;;  %v1509_v35 = vpop.f32.mrb[17].mxu0 }
 0x3ca   : > { %1553 = vst [vmem:[%s2066_s11 + $0x20] sm:$0xff] %v1540_v23  ;;  %v1806_v36 = vadd.f32 %v1419_v34, %v1277_v20  ;;  %v1510_v37 = vadd.f32 %v1509_v35, %v1461_v29  ;;  %v1421_v33 = vpop.f32.mrb[18].mxu1  ;;  %v1792_v38 = vpop.f32.mrb[18].mxu0 }
 0x3cb   : > { %v1530_v41 = vadd.f32 %v1906_v40, %v1805_v30  ;;  %v1532_v44 = vadd.f32 %v1907_v42, %v1518_v32  ;;  %v1807_v46 = vadd.f32 %v1421_v33, %v1282_v24  ;;  %v1521_v47 = vadd.f32 %v1792_v38, %v1472_v16  ;;  %v1423_v49 = vpop.f32.mrb[19].mxu1  ;;  %v1512_v50 = vpop.f32.mrb[19].mxu0 }
 0x3cc   : > { %v1531_v53 = vadd.f32 %v1908_v52, %v1806_v36  ;;  %v1526_v55 = vadd.f32 %v1909_v54, %v1510_v37  ;;  %v1808_v56 = vadd.f32 %v1423_v49, %v1282_v24  ;;  %v1513_v57 = vadd.f32 %v1512_v50, %v1464_v39 }
 0x3cd   : > { %v1542_v59 = vmul.f32 %v1530_v41, %v2344_v48  ;;  %v1544_v60 = vmul.f32 %v1532_v44, %v2352_v7  ;;  %v1533_v0 = vadd.f32 %v1910_v61, %v1807_v46  ;;  %v1535_v3 = vadd.f32 %v1911_v58, %v1521_v47 }
 0x3ce   : > { %v1543_v5 = vmul.f32 %v1531_v53, %v2346_v51  ;;  %v1538_v31 = vmul.f32 %v1526_v55, %v2352_v7  ;;  %v1534_v63 = vadd.f32 %v1912_v15, %v1808_v56  ;;  %v1529_v10 = vadd.f32 %v1913_v6, %v1513_v57 }
 0x3cf   : > { %1555 = vst [vmem:[%s2066_s11 + $0x30] sm:$0xff] %v1542_v59  ;;  %1557 = vst.msk [vmem:[%s2066_s11 + $0x40] sm:$0xff] %vm1550_vm14, %v1544_v60  ;;  %v1545_v45 = vmul.f32 %v1533_v0, %v2344_v48  ;;  %v1547_v8 = vmul.f32 %v1535_v3, %v2352_v7 }
 0x3d0   : > { %1556 = vst [vmem:[%s2066_s11 + $0x38] sm:$0xff] %v1543_v5  ;;  %1551 = vst.msk [vmem:[%s2066_s11 + $0x10] sm:$0xff] %vm1550_vm14, %v1538_v31  ;;  %v1546_v43 = vmul.f32 %v1534_v63, %v2346_v51  ;;  %v1541_v1 = vmul.f32 %v1529_v10, %v2352_v7 }
 0x3d1   : > { %1558 = vst [vmem:[%s2066_s11 + $0x48] sm:$0xff] %v1545_v45  ;;  %1560 = vst.msk [vmem:[%s2066_s11 + $0x58] sm:$0xff] %vm1550_vm14, %v1547_v8 }
 0x3d2   : > { %1559 = vst [vmem:[%s2066_s11 + $0x50] sm:$0xff] %v1546_v43  ;;  %1554 = vst.msk [vmem:[%s2066_s11 + $0x28] sm:$0xff] %vm1550_vm14, %v1541_v1 }
 0x3d3 PF: > { %s16_s25 = sadd.s32 1, %s1952_s25   ;;  %s2669_s21 = smov %s1944_s23 }
 0x3d4   : > { %p13_p8 = scmp.ge.s32.totalorder %s16_s25, 6   ;;  %s2670_s22 = smov %s1948_s24 }
 0x3d5   : > { %s2671_s23 = smov %s2674_s26  ;;  %s2672_s24 = smov %s2678_s27 }
 0x3d6   :  { %15 = sbr.rel (!%p13_p8) target bundleno = 3 (0x3), region = 90 }

</bundles_post_ra>
